<compile_context>
chip_gen: v5e
topology: v5e:2x2
jax: 0.10.0
libtpu: 0.0.40
codegen_flags: <defaults>
</compile_context>

<pallas_src>
import math

import jax
import jax.numpy as jnp
from jax import lax
from jax.experimental import pallas as pl
from jax.experimental.pallas import tpu as pltpu

LN_EPS = 1e-5          # PyTorch nn.LayerNorm default
MASK_NEG = -1e9        # additive bias for masked keys (exp() underflows to 0)


def _fast_recip(x):
    """EUP approximate reciprocal + one Newton-Raphson step (near-exact f32)."""
    r = pl.reciprocal(x, approx=True)
    return r * (2.0 - x * r)


def _erf_approx(x):
    """Abramowitz & Stegun 7.1.26 erf approximation (max abs err ~1.5e-7)."""
    a1, a2, a3, a4, a5 = (0.254829592, -0.284496736, 1.421413741,
                          -1.453152027, 1.061405429)
    p = 0.3275911
    s = jnp.where(x >= 0.0, 1.0, -1.0)
    z = jnp.abs(x)
    t = _fast_recip(1.0 + p * z)
    poly = ((((a5 * t + a4) * t + a3) * t + a2) * t + a1) * t
    return s * (1.0 - poly * jnp.exp(-z * z))


def _gelu_exact(x):
    # PyTorch nn.GELU() default (exact erf form).
    return 0.5 * x * (1.0 + _erf_approx(x * (1.0 / math.sqrt(2.0))))


def _layernorm(x, gamma, beta):
    """Two-pass (mean-subtracted) LayerNorm over the last axis."""
    mean = jnp.mean(x, axis=-1, keepdims=True)
    xc = x - mean
    var = jnp.mean(xc * xc, axis=-1, keepdims=True)
    return xc * lax.rsqrt(var + LN_EPS) * gamma + beta


def _make_kernel(num_heads, head_dim, cdt):
    """cdt = matmul operand dtype (f32 or bf16); accumulation is always f32."""

    def kernel(q_ref, k_ref, v_ref, mb_ref,
               wq3_ref, wk_ref, wv3_ref, wo_ref,
               bq3_ref, bv3_ref, vecs_ref, w1_ref, bf1_ref, w2_ref,
               o_ref,
               kt_scr, v_scr, attn_scr):
        # vecs rows: 0=bk 1=bo 2=ln1_g 3=ln1_b 4=ln2_g 5=ln2_b 6=ffn_b2 7=pad

        # ---- K/V projection + head layouts: ONCE per batch (qi == 0) ----
        @pl.when(pl.program_id(1) == 0)
        def _project_kv():
            k_in = k_ref[0].astype(cdt)                      # (Sk, H)
            v_in = v_ref[0].astype(cdt)                      # (Sk, H)
            k_proj = jnp.dot(k_in, wk_ref[...],
                             preferred_element_type=jnp.float32) + vecs_ref[0:1, :]
            kt_scr[...] = k_proj.T.astype(cdt)               # (H, Sk): 1 transpose/batch
            for h in range(num_heads):
                vh = jnp.dot(v_in, wv3_ref[h],
                             preferred_element_type=jnp.float32) + bv3_ref[h]
                v_scr[h] = vh.astype(cdt)                    # (Sk, hd)

        q_in = q_ref[0]                                      # (TQ, H) f32
        q_c = q_in.astype(cdt)
        bias = mb_ref[0]                                     # (1, Sk) additive mask
        vecs = vecs_ref[...]                                 # (8, H)

        # ---- per-head attention; head outputs packed into attn_scr ----
        # TODO(synk): switch to lax.fori_loop over heads if NH grows large
        # enough to cause vreg spills.
        for h in range(num_heads):
            lo = h * head_dim
            # scale & bq already folded into wq3/bq3 wrapper-side.
            qh = jnp.dot(q_c, wq3_ref[h],
                         preferred_element_type=jnp.float32) + bq3_ref[h]   # (TQ, hd)
            s = jnp.dot(qh.astype(cdt), kt_scr[lo:lo + head_dim, :],
                        preferred_element_type=jnp.float32)                 # (TQ, Sk)
            s = s + bias
            s = s - jnp.max(s, axis=-1, keepdims=True)
            p = jnp.exp(s)
            p = p * _fast_recip(jnp.sum(p, axis=-1, keepdims=True))
            oh = jnp.dot(p.astype(cdt), v_scr[h],
                         preferred_element_type=jnp.float32)                # (TQ, hd)
            attn_scr[:, lo:lo + head_dim] = oh

        # ---- single full-K out-projection ----
        attn = jnp.dot(attn_scr[...].astype(cdt), wo_ref[...],
                       preferred_element_type=jnp.float32) + vecs[1:2, :]

        # ---- residual + LayerNorm 1 (dropout1 identity in eval mode) ----
        y1 = _layernorm(q_in + attn, vecs[2:3, :], vecs[3:4, :])

        # ---- FFN: Linear -> exact GELU -> Linear (FFN dropout identity) ----
        h1 = jnp.dot(y1.astype(cdt), w1_ref[...],
                     preferred_element_type=jnp.float32) + bf1_ref[...]
        h1 = _gelu_exact(h1)
        ffn = jnp.dot(h1.astype(cdt), w2_ref[...],
                      preferred_element_type=jnp.float32) + vecs[6:7, :]

        # ---- residual + LayerNorm 2 (dropout2 identity in eval mode) ----
        out = _layernorm(y1 + ffn, vecs[4:5, :], vecs[5:6, :])
        o_ref[0] = out.astype(o_ref.dtype)

    return kernel


def _pick_query_tile(sq):
    if sq <= 256:
        return sq
    for t in (256, 128, 64, 32, 16, 8):
        if sq % t == 0:
            return t
    return sq


def cross_attention_layer(query, key, value, key_padding_mask,
                          wq, wk, wv, bq, bk, bv, wo, bo,
                          ln1_g, ln1_b, w1, b1, w2, b2, ln2_g, ln2_b,
                          *, num_heads, matmul_dtype=jnp.float32):
    """
    query            : (B, Sq, H) f32
    key, value       : (B, Sk, H) f32
    key_padding_mask : (B, Sk) bool, True = ignore key position (or None)
    wq/wk/wv/wo      : (H, H) f32, input-major (y = x @ W + b); bq/bk/bv/bo: (H,)
    ln1_g/ln1_b/ln2_g/ln2_b : (H,)
    w1 : (H, 4H), b1 : (4H,), w2 : (4H, H), b2 : (H,)
    matmul_dtype     : jnp.float32 or jnp.bfloat16 (MXU operand dtype)
    returns          : (B, Sq, H) f32
    """
    B, Sq, H = query.shape
    Sk = key.shape[1]
    assert H % num_heads == 0
    hd = H // num_heads
    scale = 1.0 / math.sqrt(hd)
    cdt = matmul_dtype

    # Per-head weight layouts (leading head axis -> free Ref views in-kernel).
    # Attention scale is folded into Wq / bq.
    wq3 = (wq * scale).reshape(H, num_heads, hd).transpose(1, 0, 2).astype(cdt)
    bq3 = (bq * scale).reshape(num_heads, 1, hd).astype(jnp.float32)
    wv3 = wv.reshape(H, num_heads, hd).transpose(1, 0, 2).astype(cdt)
    bv3 = bv.reshape(num_heads, 1, hd).astype(jnp.float32)
    wk_c = wk.astype(cdt)
    wo_c = wo.astype(cdt)
    w1_c = w1.astype(cdt)
    w2_c = w2.astype(cdt)
    bf1 = b1.reshape(1, 4 * H).astype(jnp.float32)

    # Pack small per-channel vectors into a single (8, H) block (one DMA).
    vecs = jnp.stack([bk, bo, ln1_g, ln1_b, ln2_g, ln2_b, b2,
                      jnp.zeros_like(bk)]).astype(jnp.float32)

    if key_padding_mask is None:
        mask_bias = jnp.zeros((B, 1, Sk), jnp.float32)
    else:
        mask_bias = jnp.where(key_padding_mask, MASK_NEG, 0.0).astype(
            jnp.float32).reshape(B, 1, Sk)

    tq = _pick_query_tile(Sq)
    assert Sq % tq == 0
    grid = (B, Sq // tq)   # batch parallel (megacore), q-tiles sequential

    c2 = lambda b, qi: (0, 0)
    c3 = lambda b, qi: (0, 0, 0)
    per_batch = lambda b, qi: (b, 0, 0)

    return pl.pallas_call(
        _make_kernel(num_heads, hd, cdt),
        out_shape=jax.ShapeDtypeStruct((B, Sq, H), jnp.float32),
        grid=grid,
        in_specs=[
            pl.BlockSpec((1, tq, H), lambda b, qi: (b, qi, 0)),   # query tile
            pl.BlockSpec((1, Sk, H), per_batch),                  # key (raw)
            pl.BlockSpec((1, Sk, H), per_batch),                  # value (raw)
            pl.BlockSpec((1, 1, Sk), per_batch),                  # key-padding bias
            pl.BlockSpec((num_heads, H, hd), c3),                 # Wq (scaled, per-head)
            pl.BlockSpec((H, H), c2),                             # Wk
            pl.BlockSpec((num_heads, H, hd), c3),                 # Wv (per-head)
            pl.BlockSpec((H, H), c2),                             # Wo
            pl.BlockSpec((num_heads, 1, hd), c3),                 # bq (scaled, per-head)
            pl.BlockSpec((num_heads, 1, hd), c3),                 # bv (per-head)
            pl.BlockSpec((8, H), c2),                             # packed small vectors
            pl.BlockSpec((H, 4 * H), c2),                         # W1
            pl.BlockSpec((1, 4 * H), c2),                         # b1
            pl.BlockSpec((4 * H, H), c2),                         # W2
        ],
        out_specs=pl.BlockSpec((1, tq, H), lambda b, qi: (b, qi, 0)),
        scratch_shapes=[
            pltpu.VMEM((H, Sk), cdt),                  # K^T, projected once/batch
            pltpu.VMEM((num_heads, Sk, hd), cdt),      # V per head, once/batch
            pltpu.VMEM((tq, H), jnp.float32),          # packed head outputs
        ],
        compiler_params=pltpu.CompilerParams(
            dimension_semantics=("parallel", "arbitrary"),
            vmem_limit_bytes=48 * 1024 * 1024),
    )(query, key, value, mask_bias,
      wq3, wk_c, wv3, wo_c, bq3, bv3, vecs, w1_c, bf1, w2_c)


def _reference(query, key, value, key_padding_mask,
               wq, wk, wv, bq, bk, bv, wo, bo,
               ln1_g, ln1_b, w1, b1, w2, b2, ln2_g, ln2_b, *, num_heads):
    """Pure-JAX mirror of the PyTorch forward (eval mode)."""
    B, Sq, H = query.shape
    Sk = key.shape[1]
    hd = H // num_heads

    def ln(x, g, b):
        mean = jnp.mean(x, axis=-1, keepdims=True)
        var = jnp.mean((x - mean) ** 2, axis=-1, keepdims=True)
        return (x - mean) / jnp.sqrt(var + LN_EPS) * g + b

    q = query @ wq + bq
    k = key @ wk + bk
    v = value @ wv + bv
    q = q.reshape(B, Sq, num_heads, hd).transpose(0, 2, 1, 3)
    k = k.reshape(B, Sk, num_heads, hd).transpose(0, 2, 1, 3)
    v = v.reshape(B, Sk, num_heads, hd).transpose(0, 2, 1, 3)
    s = jnp.einsum('bhqd,bhkd->bhqk', q, k) / math.sqrt(hd)
    if key_padding_mask is not None:
        s = s + jnp.where(key_padding_mask, MASK_NEG, 0.0)[:, None, None, :]
    p = jax.nn.softmax(s, axis=-1)
    o = jnp.einsum('bhqk,bhkd->bhqd', p, v)
    o = o.transpose(0, 2, 1, 3).reshape(B, Sq, H)
    attn = o @ wo + bo
    y1 = ln(query + attn, ln1_g, ln1_b)
    h1 = y1 @ w1 + b1
    h1 = 0.5 * h1 * (1.0 + jax.scipy.special.erf(h1 / math.sqrt(2.0)))  # exact GELU
    ffn = h1 @ w2 + b2
    return ln(y1 + ffn, ln2_g, ln2_b)


if __name__ == "__main__":
    B, Sq, Sk = 2, 8, 16
    H, NH = 64, 8                     # head_dim = 8

    root = jax.random.PRNGKey(0)
    (k_q, k_k, k_v, k_wq, k_wk, k_wv, k_bq, k_bk, k_bv, k_wo, k_bo,
     k_g1, k_b1, k_w1, k_bf1, k_w2, k_bf2, k_g2, k_b2) = jax.random.split(root, 19)

    query = jax.random.normal(k_q, (B, Sq, H), jnp.float32) * 0.5
    key_t = jax.random.normal(k_k, (B, Sk, H), jnp.float32) * 0.5
    value = jax.random.normal(k_v, (B, Sk, H), jnp.float32) * 0.5

    # key_padding_mask: True = padded/ignored key position.
    # batch 0: no padding, batch 1: last 4 keys padded.
    lengths = jnp.array([Sk, Sk - 4], jnp.int32)
    key_padding_mask = jnp.arange(Sk)[None, :] >= lengths[:, None]

    def u(k, shape, s):
        return jax.random.uniform(k, shape, jnp.float32, -s, s)

    ws = math.sqrt(6.0 / (H + H))
    wq = u(k_wq, (H, H), ws)
    wk = u(k_wk, (H, H), ws)
    wv = u(k_wv, (H, H), ws)
    wo = u(k_wo, (H, H), ws)
    bq = u(k_bq, (H,), 0.1)
    bk = u(k_bk, (H,), 0.1)
    bv = u(k_bv, (H,), 0.1)
    bo = u(k_bo, (H,), 0.1)
    ln1_g = 1.0 + u(k_g1, (H,), 0.2)
    ln1_b = u(k_b1, (H,), 0.1)
    ln2_g = 1.0 + u(k_g2, (H,), 0.2)
    ln2_b = u(k_b2, (H,), 0.1)
    wf = math.sqrt(6.0 / (H + 4 * H))
    w1 = u(k_w1, (H, 4 * H), wf)
    b1 = u(k_bf1, (4 * H,), 0.1)
    w2 = u(k_w2, (4 * H, H), wf)
    b2 = u(k_bf2, (H,), 0.1)

    ref = _reference(query, key_t, value, key_padding_mask,
                     wq, wk, wv, bq, bk, bv, wo, bo,
                     ln1_g, ln1_b, w1, b1, w2, b2, ln2_g, ln2_b, num_heads=NH)

    # f32 matmuls: tight tolerance. bf16 matmuls (v6e/v7x MXU fast path):
    # looser tolerance, as expected for bf16 operands with f32 accumulation.
    for dt, tol in ((jnp.float32, 2e-4), (jnp.bfloat16, 5e-2)):
        out = cross_attention_layer(query, key_t, value, key_padding_mask,
                                    wq, wk, wv, bq, bk, bv, wo, bo,
                                    ln1_g, ln1_b, w1, b1, w2, b2, ln2_g, ln2_b,
                                    num_heads=NH, matmul_dtype=dt)
        out = jax.block_until_ready(out)
        assert out.shape == (B, Sq, H)
        max_err = float(jnp.max(jnp.abs(out - ref)))
        assert max_err < tol, f"{dt} mismatch vs reference: max_err={max_err}"

    print("KERNEL_OK")
</pallas_src>

<mosaic_0001>
module attributes {stable_mosaic.version = 11 : i64} {
  func.func @kernel(%arg0: i32, %arg1: i32, %arg2: memref<1x8x64xf32, #tpu.memory_space<vmem>>, %arg3: memref<1x16x64xf32, #tpu.memory_space<vmem>>, %arg4: memref<1x16x64xf32, #tpu.memory_space<vmem>>, %arg5: memref<1x1x16xf32, #tpu.memory_space<vmem>>, %arg6: memref<8x64x8xf32, #tpu.memory_space<vmem>>, %arg7: memref<64x64xf32, #tpu.memory_space<vmem>>, %arg8: memref<8x64x8xf32, #tpu.memory_space<vmem>>, %arg9: memref<64x64xf32, #tpu.memory_space<vmem>>, %arg10: memref<8x1x8xf32, #tpu.memory_space<vmem>>, %arg11: memref<8x1x8xf32, #tpu.memory_space<vmem>>, %arg12: memref<8x64xf32, #tpu.memory_space<vmem>>, %arg13: memref<64x256xf32, #tpu.memory_space<vmem>>, %arg14: memref<1x256xf32, #tpu.memory_space<vmem>>, %arg15: memref<256x64xf32, #tpu.memory_space<vmem>>, %arg16: memref<1x8x64xf32, #tpu.memory_space<vmem>>, %arg17: memref<64x16xf32, #tpu.memory_space<vmem>>, %arg18: memref<8x16x8xf32, #tpu.memory_space<vmem>>, %arg19: memref<8x64xf32, #tpu.memory_space<vmem>>) attributes {dimension_semantics = [#tpu.dimension_semantics<parallel>, #tpu.dimension_semantics<arbitrary>], iteration_bounds = array<i64: 2, 1>, scalar_prefetch = 0 : i64, scratch_operands = 3 : i64, tpu.core_type = #tpu.core_type<tc>, window_params = [{transform_indices = @transform_0, window_bounds = array<i64: 1, 8, 64>}, {transform_indices = @transform_1, window_bounds = array<i64: 1, 16, 64>}, {transform_indices = @transform_2, window_bounds = array<i64: 1, 16, 64>}, {transform_indices = @transform_3, window_bounds = array<i64: 1, 1, 16>}, {pipeline_mode = #tpu.pipeline_mode<synchronous>, transform_indices = @transform_4, window_bounds = array<i64: 8, 64, 8>}, {pipeline_mode = #tpu.pipeline_mode<synchronous>, transform_indices = @transform_5, window_bounds = array<i64: 64, 64>}, {pipeline_mode = #tpu.pipeline_mode<synchronous>, transform_indices = @transform_6, window_bounds = array<i64: 8, 64, 8>}, {pipeline_mode = #tpu.pipeline_mode<synchronous>, transform_indices = @transform_7, window_bounds = array<i64: 64, 64>}, {pipeline_mode = #tpu.pipeline_mode<synchronous>, transform_indices = @transform_8, window_bounds = array<i64: 8, 1, 8>}, {pipeline_mode = #tpu.pipeline_mode<synchronous>, transform_indices = @transform_9, window_bounds = array<i64: 8, 1, 8>}, {pipeline_mode = #tpu.pipeline_mode<synchronous>, transform_indices = @transform_10, window_bounds = array<i64: 8, 64>}, {pipeline_mode = #tpu.pipeline_mode<synchronous>, transform_indices = @transform_11, window_bounds = array<i64: 64, 256>}, {pipeline_mode = #tpu.pipeline_mode<synchronous>, transform_indices = @transform_12, window_bounds = array<i64: 1, 256>}, {pipeline_mode = #tpu.pipeline_mode<synchronous>, transform_indices = @transform_13, window_bounds = array<i64: 256, 64>}, {transform_indices = @transform_14, window_bounds = array<i64: 1, 8, 64>}]} {
    %c0_i32 = arith.constant 0 : i32
    %0 = arith.cmpi eq, %arg1, %c0_i32 : i32
    %1 = arith.extui %0 : i1 to i32
    %c0_i32_0 = arith.constant 0 : i32
    %2 = arith.cmpi ne, %1, %c0_i32_0 : i32
    scf.if %2 {
      %c0_187 = arith.constant 0 : index
      %c0_188 = arith.constant 0 : index
      %c0_189 = arith.constant 0 : index
      %349 = vector.load %arg3[%c0_187, %c0_188, %c0_189] : memref<1x16x64xf32, #tpu.memory_space<vmem>>, vector<1x16x64xf32>
      %350 = vector.shape_cast %349 : vector<1x16x64xf32> to vector<16x64xf32>
      %c0_190 = arith.constant 0 : index
      %c0_191 = arith.constant 0 : index
      %c0_192 = arith.constant 0 : index
      %351 = vector.load %arg4[%c0_190, %c0_191, %c0_192] : memref<1x16x64xf32, #tpu.memory_space<vmem>>, vector<1x16x64xf32>
      %352 = vector.shape_cast %351 : vector<1x16x64xf32> to vector<16x64xf32>
      %c0_193 = arith.constant 0 : index
      %c0_194 = arith.constant 0 : index
      %353 = vector.load %arg7[%c0_193, %c0_194] : memref<64x64xf32, #tpu.memory_space<vmem>>, vector<64x64xf32>
      %cst_195 = arith.constant dense<0.000000e+00> : vector<16x64xf32>
      %354 = tpu.matmul %350, %353, %cst_195 {dimension_numbers = #tpu.dot_dimension_numbers<[1], [0], [0], [1], [0, 0, 1, 1], [], []>} : vector<16x64xf32>, vector<64x64xf32>, vector<16x64xf32> -> vector<16x64xf32>
      %c0_196 = arith.constant 0 : index
      %c0_197 = arith.constant 0 : index
      %355 = vector.load %arg12[%c0_196, %c0_197] : memref<8x64xf32, #tpu.memory_space<vmem>>, vector<1x64xf32>
      %356 = vector.broadcast %355 : vector<1x64xf32> to vector<16x64xf32>
      %357 = arith.addf %354, %356 : vector<16x64xf32>
      %358 = tpu.transpose %357, [1, 0] : vector<16x64xf32> -> vector<64x16xf32>
      %c0_198 = arith.constant 0 : index
      %c0_199 = arith.constant 0 : index
      %359 = vector.load %arg17[%c0_198, %c0_199] : memref<64x16xf32, #tpu.memory_space<vmem>>, vector<64x16xf32>
      tpu.vector_store %arg17[%c0_198, %c0_199], %358 {strides = array<i32>} : memref<64x16xf32, #tpu.memory_space<vmem>>, vector<64x16xf32>,
      %c0_200 = arith.constant 0 : index
      %c0_201 = arith.constant 0 : index
      %c0_202 = arith.constant 0 : index
      %360 = vector.load %arg8[%c0_200, %c0_201, %c0_202] : memref<8x64x8xf32, #tpu.memory_space<vmem>>, vector<1x64x8xf32>
      %361 = vector.shape_cast %360 : vector<1x64x8xf32> to vector<64x8xf32>
      %cst_203 = arith.constant dense<0.000000e+00> : vector<16x8xf32>
      %362 = tpu.matmul %352, %361, %cst_203 {dimension_numbers = #tpu.dot_dimension_numbers<[1], [0], [0], [1], [0, 0, 1, 1], [], []>} : vector<16x64xf32>, vector<64x8xf32>, vector<16x8xf32> -> vector<16x8xf32>
      %c0_204 = arith.constant 0 : index
      %c0_205 = arith.constant 0 : index
      %c0_206 = arith.constant 0 : index
      %363 = vector.load %arg11[%c0_204, %c0_205, %c0_206] : memref<8x1x8xf32, #tpu.memory_space<vmem>>, vector<1x1x8xf32>
      %364 = vector.shape_cast %363 : vector<1x1x8xf32> to vector<1x8xf32>
      %365 = vector.broadcast %364 : vector<1x8xf32> to vector<16x8xf32>
      %366 = arith.addf %362, %365 : vector<16x8xf32>
      %c0_207 = arith.constant 0 : index
      %c0_208 = arith.constant 0 : index
      %c0_209 = arith.constant 0 : index
      %367 = vector.load %arg18[%c0_207, %c0_208, %c0_209] : memref<8x16x8xf32, #tpu.memory_space<vmem>>, vector<1x16x8xf32>
      %368 = vector.shape_cast %367 : vector<1x16x8xf32> to vector<16x8xf32>
      %369 = vector.shape_cast %366 : vector<16x8xf32> to vector<1x16x8xf32>
      tpu.vector_store %arg18[%c0_207, %c0_208, %c0_209], %369 {strides = array<i32>} : memref<8x16x8xf32, #tpu.memory_space<vmem>>, vector<1x16x8xf32>,
      %c1_210 = arith.constant 1 : index
      %c0_211 = arith.constant 0 : index
      %c0_212 = arith.constant 0 : index
      %370 = vector.load %arg8[%c1_210, %c0_211, %c0_212] : memref<8x64x8xf32, #tpu.memory_space<vmem>>, vector<1x64x8xf32>
      %371 = vector.shape_cast %370 : vector<1x64x8xf32> to vector<64x8xf32>
      %cst_213 = arith.constant dense<0.000000e+00> : vector<16x8xf32>
      %372 = tpu.matmul %352, %371, %cst_213 {dimension_numbers = #tpu.dot_dimension_numbers<[1], [0], [0], [1], [0, 0, 1, 1], [], []>} : vector<16x64xf32>, vector<64x8xf32>, vector<16x8xf32> -> vector<16x8xf32>
      %c1_214 = arith.constant 1 : index
      %c0_215 = arith.constant 0 : index
      %c0_216 = arith.constant 0 : index
      %373 = vector.load %arg11[%c1_214, %c0_215, %c0_216] : memref<8x1x8xf32, #tpu.memory_space<vmem>>, vector<1x1x8xf32>
      %374 = vector.shape_cast %373 : vector<1x1x8xf32> to vector<1x8xf32>
      %375 = vector.broadcast %374 : vector<1x8xf32> to vector<16x8xf32>
      %376 = arith.addf %372, %375 : vector<16x8xf32>
      %c1_217 = arith.constant 1 : index
      %c0_218 = arith.constant 0 : index
      %c0_219 = arith.constant 0 : index
      %377 = vector.load %arg18[%c1_217, %c0_218, %c0_219] : memref<8x16x8xf32, #tpu.memory_space<vmem>>, vector<1x16x8xf32>
      %378 = vector.shape_cast %377 : vector<1x16x8xf32> to vector<16x8xf32>
      %379 = vector.shape_cast %376 : vector<16x8xf32> to vector<1x16x8xf32>
      tpu.vector_store %arg18[%c1_217, %c0_218, %c0_219], %379 {strides = array<i32>} : memref<8x16x8xf32, #tpu.memory_space<vmem>>, vector<1x16x8xf32>,
      %c2_220 = arith.constant 2 : index
      %c0_221 = arith.constant 0 : index
      %c0_222 = arith.constant 0 : index
      %380 = vector.load %arg8[%c2_220, %c0_221, %c0_222] : memref<8x64x8xf32, #tpu.memory_space<vmem>>, vector<1x64x8xf32>
      %381 = vector.shape_cast %380 : vector<1x64x8xf32> to vector<64x8xf32>
      %cst_223 = arith.constant dense<0.000000e+00> : vector<16x8xf32>
      %382 = tpu.matmul %352, %381, %cst_223 {dimension_numbers = #tpu.dot_dimension_numbers<[1], [0], [0], [1], [0, 0, 1, 1], [], []>} : vector<16x64xf32>, vector<64x8xf32>, vector<16x8xf32> -> vector<16x8xf32>
      %c2_224 = arith.constant 2 : index
      %c0_225 = arith.constant 0 : index
      %c0_226 = arith.constant 0 : index
      %383 = vector.load %arg11[%c2_224, %c0_225, %c0_226] : memref<8x1x8xf32, #tpu.memory_space<vmem>>, vector<1x1x8xf32>
      %384 = vector.shape_cast %383 : vector<1x1x8xf32> to vector<1x8xf32>
      %385 = vector.broadcast %384 : vector<1x8xf32> to vector<16x8xf32>
      %386 = arith.addf %382, %385 : vector<16x8xf32>
      %c2_227 = arith.constant 2 : index
      %c0_228 = arith.constant 0 : index
      %c0_229 = arith.constant 0 : index
      %387 = vector.load %arg18[%c2_227, %c0_228, %c0_229] : memref<8x16x8xf32, #tpu.memory_space<vmem>>, vector<1x16x8xf32>
      %388 = vector.shape_cast %387 : vector<1x16x8xf32> to vector<16x8xf32>
      %389 = vector.shape_cast %386 : vector<16x8xf32> to vector<1x16x8xf32>
      tpu.vector_store %arg18[%c2_227, %c0_228, %c0_229], %389 {strides = array<i32>} : memref<8x16x8xf32, #tpu.memory_space<vmem>>, vector<1x16x8xf32>,
      %c3_230 = arith.constant 3 : index
      %c0_231 = arith.constant 0 : index
      %c0_232 = arith.constant 0 : index
      %390 = vector.load %arg8[%c3_230, %c0_231, %c0_232] : memref<8x64x8xf32, #tpu.memory_space<vmem>>, vector<1x64x8xf32>
      %391 = vector.shape_cast %390 : vector<1x64x8xf32> to vector<64x8xf32>
      %cst_233 = arith.constant dense<0.000000e+00> : vector<16x8xf32>
      %392 = tpu.matmul %352, %391, %cst_233 {dimension_numbers = #tpu.dot_dimension_numbers<[1], [0], [0], [1], [0, 0, 1, 1], [], []>} : vector<16x64xf32>, vector<64x8xf32>, vector<16x8xf32> -> vector<16x8xf32>
      %c3_234 = arith.constant 3 : index
      %c0_235 = arith.constant 0 : index
      %c0_236 = arith.constant 0 : index
      %393 = vector.load %arg11[%c3_234, %c0_235, %c0_236] : memref<8x1x8xf32, #tpu.memory_space<vmem>>, vector<1x1x8xf32>
      %394 = vector.shape_cast %393 : vector<1x1x8xf32> to vector<1x8xf32>
      %395 = vector.broadcast %394 : vector<1x8xf32> to vector<16x8xf32>
      %396 = arith.addf %392, %395 : vector<16x8xf32>
      %c3_237 = arith.constant 3 : index
      %c0_238 = arith.constant 0 : index
      %c0_239 = arith.constant 0 : index
      %397 = vector.load %arg18[%c3_237, %c0_238, %c0_239] : memref<8x16x8xf32, #tpu.memory_space<vmem>>, vector<1x16x8xf32>
      %398 = vector.shape_cast %397 : vector<1x16x8xf32> to vector<16x8xf32>
      %399 = vector.shape_cast %396 : vector<16x8xf32> to vector<1x16x8xf32>
      tpu.vector_store %arg18[%c3_237, %c0_238, %c0_239], %399 {strides = array<i32>} : memref<8x16x8xf32, #tpu.memory_space<vmem>>, vector<1x16x8xf32>,
      %c4_240 = arith.constant 4 : index
      %c0_241 = arith.constant 0 : index
      %c0_242 = arith.constant 0 : index
      %400 = vector.load %arg8[%c4_240, %c0_241, %c0_242] : memref<8x64x8xf32, #tpu.memory_space<vmem>>, vector<1x64x8xf32>
      %401 = vector.shape_cast %400 : vector<1x64x8xf32> to vector<64x8xf32>
      %cst_243 = arith.constant dense<0.000000e+00> : vector<16x8xf32>
      %402 = tpu.matmul %352, %401, %cst_243 {dimension_numbers = #tpu.dot_dimension_numbers<[1], [0], [0], [1], [0, 0, 1, 1], [], []>} : vector<16x64xf32>, vector<64x8xf32>, vector<16x8xf32> -> vector<16x8xf32>
      %c4_244 = arith.constant 4 : index
      %c0_245 = arith.constant 0 : index
      %c0_246 = arith.constant 0 : index
      %403 = vector.load %arg11[%c4_244, %c0_245, %c0_246] : memref<8x1x8xf32, #tpu.memory_space<vmem>>, vector<1x1x8xf32>
      %404 = vector.shape_cast %403 : vector<1x1x8xf32> to vector<1x8xf32>
      %405 = vector.broadcast %404 : vector<1x8xf32> to vector<16x8xf32>
      %406 = arith.addf %402, %405 : vector<16x8xf32>
      %c4_247 = arith.constant 4 : index
      %c0_248 = arith.constant 0 : index
      %c0_249 = arith.constant 0 : index
      %407 = vector.load %arg18[%c4_247, %c0_248, %c0_249] : memref<8x16x8xf32, #tpu.memory_space<vmem>>, vector<1x16x8xf32>
      %408 = vector.shape_cast %407 : vector<1x16x8xf32> to vector<16x8xf32>
      %409 = vector.shape_cast %406 : vector<16x8xf32> to vector<1x16x8xf32>
      tpu.vector_store %arg18[%c4_247, %c0_248, %c0_249], %409 {strides = array<i32>} : memref<8x16x8xf32, #tpu.memory_space<vmem>>, vector<1x16x8xf32>,
      %c5_250 = arith.constant 5 : index
      %c0_251 = arith.constant 0 : index
      %c0_252 = arith.constant 0 : index
      %410 = vector.load %arg8[%c5_250, %c0_251, %c0_252] : memref<8x64x8xf32, #tpu.memory_space<vmem>>, vector<1x64x8xf32>
      %411 = vector.shape_cast %410 : vector<1x64x8xf32> to vector<64x8xf32>
      %cst_253 = arith.constant dense<0.000000e+00> : vector<16x8xf32>
      %412 = tpu.matmul %352, %411, %cst_253 {dimension_numbers = #tpu.dot_dimension_numbers<[1], [0], [0], [1], [0, 0, 1, 1], [], []>} : vector<16x64xf32>, vector<64x8xf32>, vector<16x8xf32> -> vector<16x8xf32>
      %c5_254 = arith.constant 5 : index
      %c0_255 = arith.constant 0 : index
      %c0_256 = arith.constant 0 : index
      %413 = vector.load %arg11[%c5_254, %c0_255, %c0_256] : memref<8x1x8xf32, #tpu.memory_space<vmem>>, vector<1x1x8xf32>
      %414 = vector.shape_cast %413 : vector<1x1x8xf32> to vector<1x8xf32>
      %415 = vector.broadcast %414 : vector<1x8xf32> to vector<16x8xf32>
      %416 = arith.addf %412, %415 : vector<16x8xf32>
      %c5_257 = arith.constant 5 : index
      %c0_258 = arith.constant 0 : index
      %c0_259 = arith.constant 0 : index
      %417 = vector.load %arg18[%c5_257, %c0_258, %c0_259] : memref<8x16x8xf32, #tpu.memory_space<vmem>>, vector<1x16x8xf32>
      %418 = vector.shape_cast %417 : vector<1x16x8xf32> to vector<16x8xf32>
      %419 = vector.shape_cast %416 : vector<16x8xf32> to vector<1x16x8xf32>
      tpu.vector_store %arg18[%c5_257, %c0_258, %c0_259], %419 {strides = array<i32>} : memref<8x16x8xf32, #tpu.memory_space<vmem>>, vector<1x16x8xf32>,
      %c6_260 = arith.constant 6 : index
      %c0_261 = arith.constant 0 : index
      %c0_262 = arith.constant 0 : index
      %420 = vector.load %arg8[%c6_260, %c0_261, %c0_262] : memref<8x64x8xf32, #tpu.memory_space<vmem>>, vector<1x64x8xf32>
      %421 = vector.shape_cast %420 : vector<1x64x8xf32> to vector<64x8xf32>
      %cst_263 = arith.constant dense<0.000000e+00> : vector<16x8xf32>
      %422 = tpu.matmul %352, %421, %cst_263 {dimension_numbers = #tpu.dot_dimension_numbers<[1], [0], [0], [1], [0, 0, 1, 1], [], []>} : vector<16x64xf32>, vector<64x8xf32>, vector<16x8xf32> -> vector<16x8xf32>
      %c6_264 = arith.constant 6 : index
      %c0_265 = arith.constant 0 : index
      %c0_266 = arith.constant 0 : index
      %423 = vector.load %arg11[%c6_264, %c0_265, %c0_266] : memref<8x1x8xf32, #tpu.memory_space<vmem>>, vector<1x1x8xf32>
      %424 = vector.shape_cast %423 : vector<1x1x8xf32> to vector<1x8xf32>
      %425 = vector.broadcast %424 : vector<1x8xf32> to vector<16x8xf32>
      %426 = arith.addf %422, %425 : vector<16x8xf32>
      %c6_267 = arith.constant 6 : index
      %c0_268 = arith.constant 0 : index
      %c0_269 = arith.constant 0 : index
      %427 = vector.load %arg18[%c6_267, %c0_268, %c0_269] : memref<8x16x8xf32, #tpu.memory_space<vmem>>, vector<1x16x8xf32>
      %428 = vector.shape_cast %427 : vector<1x16x8xf32> to vector<16x8xf32>
      %429 = vector.shape_cast %426 : vector<16x8xf32> to vector<1x16x8xf32>
      tpu.vector_store %arg18[%c6_267, %c0_268, %c0_269], %429 {strides = array<i32>} : memref<8x16x8xf32, #tpu.memory_space<vmem>>, vector<1x16x8xf32>,
      %c7_270 = arith.constant 7 : index
      %c0_271 = arith.constant 0 : index
      %c0_272 = arith.constant 0 : index
      %430 = vector.load %arg8[%c7_270, %c0_271, %c0_272] : memref<8x64x8xf32, #tpu.memory_space<vmem>>, vector<1x64x8xf32>
      %431 = vector.shape_cast %430 : vector<1x64x8xf32> to vector<64x8xf32>
      %cst_273 = arith.constant dense<0.000000e+00> : vector<16x8xf32>
      %432 = tpu.matmul %352, %431, %cst_273 {dimension_numbers = #tpu.dot_dimension_numbers<[1], [0], [0], [1], [0, 0, 1, 1], [], []>} : vector<16x64xf32>, vector<64x8xf32>, vector<16x8xf32> -> vector<16x8xf32>
      %c7_274 = arith.constant 7 : index
      %c0_275 = arith.constant 0 : index
      %c0_276 = arith.constant 0 : index
      %433 = vector.load %arg11[%c7_274, %c0_275, %c0_276] : memref<8x1x8xf32, #tpu.memory_space<vmem>>, vector<1x1x8xf32>
      %434 = vector.shape_cast %433 : vector<1x1x8xf32> to vector<1x8xf32>
      %435 = vector.broadcast %434 : vector<1x8xf32> to vector<16x8xf32>
      %436 = arith.addf %432, %435 : vector<16x8xf32>
      %c7_277 = arith.constant 7 : index
      %c0_278 = arith.constant 0 : index
      %c0_279 = arith.constant 0 : index
      %437 = vector.load %arg18[%c7_277, %c0_278, %c0_279] : memref<8x16x8xf32, #tpu.memory_space<vmem>>, vector<1x16x8xf32>
      %438 = vector.shape_cast %437 : vector<1x16x8xf32> to vector<16x8xf32>
      %439 = vector.shape_cast %436 : vector<16x8xf32> to vector<1x16x8xf32>
      tpu.vector_store %arg18[%c7_277, %c0_278, %c0_279], %439 {strides = array<i32>} : memref<8x16x8xf32, #tpu.memory_space<vmem>>, vector<1x16x8xf32>,
    } else {
    }
    %c0 = arith.constant 0 : index
    %c0_1 = arith.constant 0 : index
    %c0_2 = arith.constant 0 : index
    %3 = vector.load %arg2[%c0, %c0_1, %c0_2] : memref<1x8x64xf32, #tpu.memory_space<vmem>>, vector<1x8x64xf32>
    %4 = vector.shape_cast %3 : vector<1x8x64xf32> to vector<8x64xf32>
    %c0_3 = arith.constant 0 : index
    %c0_4 = arith.constant 0 : index
    %c0_5 = arith.constant 0 : index
    %5 = vector.load %arg5[%c0_3, %c0_4, %c0_5] : memref<1x1x16xf32, #tpu.memory_space<vmem>>, vector<1x1x16xf32>
    %6 = vector.shape_cast %5 : vector<1x1x16xf32> to vector<1x16xf32>
    %c0_6 = arith.constant 0 : index
    %c0_7 = arith.constant 0 : index
    %7 = vector.load %arg12[%c0_6, %c0_7] : memref<8x64xf32, #tpu.memory_space<vmem>>, vector<8x64xf32>
    %c0_8 = arith.constant 0 : index
    %c0_9 = arith.constant 0 : index
    %c0_10 = arith.constant 0 : index
    %8 = vector.load %arg6[%c0_8, %c0_9, %c0_10] : memref<8x64x8xf32, #tpu.memory_space<vmem>>, vector<1x64x8xf32>
    %9 = vector.shape_cast %8 : vector<1x64x8xf32> to vector<64x8xf32>
    %cst = arith.constant dense<0.000000e+00> : vector<8x8xf32>
    %10 = tpu.matmul %4, %9, %cst {dimension_numbers = #tpu.dot_dimension_numbers<[1], [0], [0], [1], [0, 0, 1, 1], [], []>} : vector<8x64xf32>, vector<64x8xf32>, vector<8x8xf32> -> vector<8x8xf32>
    %c0_11 = arith.constant 0 : index
    %c0_12 = arith.constant 0 : index
    %c0_13 = arith.constant 0 : index
    %11 = vector.load %arg10[%c0_11, %c0_12, %c0_13] : memref<8x1x8xf32, #tpu.memory_space<vmem>>, vector<1x1x8xf32>
    %12 = vector.shape_cast %11 : vector<1x1x8xf32> to vector<1x8xf32>
    %13 = vector.broadcast %12 : vector<1x8xf32> to vector<8x8xf32>
    %14 = arith.addf %10, %13 : vector<8x8xf32>
    %c0_14 = arith.constant 0 : index
    %c0_15 = arith.constant 0 : index
    %15 = vector.load %arg17[%c0_14, %c0_15] : memref<64x16xf32, #tpu.memory_space<vmem>>, vector<8x16xf32>
    %cst_16 = arith.constant dense<0.000000e+00> : vector<8x16xf32>
    %16 = tpu.matmul %14, %15, %cst_16 {dimension_numbers = #tpu.dot_dimension_numbers<[1], [0], [0], [1], [0, 0, 1, 1], [], []>} : vector<8x8xf32>, vector<8x16xf32>, vector<8x16xf32> -> vector<8x16xf32>
    %17 = vector.broadcast %6 : vector<1x16xf32> to vector<8x16xf32>
    %18 = arith.addf %16, %17 : vector<8x16xf32>
    %cst_17 = arith.constant dense<0xFF800000> : vector<8xf32>
    %19 = vector.multi_reduction <maximumf>, %18, %cst_17 [1] : vector<8x16xf32> to vector<8xf32>
    %20 = vector.shape_cast %19 : vector<8xf32> to vector<8x1xf32>
    %21 = vector.broadcast %20 : vector<8x1xf32> to vector<8x16xf32>
    %22 = arith.subf %18, %21 : vector<8x16xf32>
    %23 = math.exp %22 : vector<8x16xf32>
    %cst_18 = arith.constant dense<0.000000e+00> : vector<8xf32>
    %24 = vector.multi_reduction <add>, %23, %cst_18 [1] : vector<8x16xf32> to vector<8xf32>
    %25 = vector.shape_cast %24 : vector<8xf32> to vector<8x1xf32>
    %26 = tpu.reciprocal %25 {approx = true} : vector<8x1xf32> -> vector<8x1xf32>
    %27 = arith.mulf %25, %26 : vector<8x1xf32>
    %cst_19 = arith.constant 2.000000e+00 : f32
    %28 = vector.broadcast %cst_19 : f32 to vector<8x1xf32>
    %29 = arith.subf %28, %27 : vector<8x1xf32>
    %30 = arith.mulf %26, %29 : vector<8x1xf32>
    %31 = vector.broadcast %30 : vector<8x1xf32> to vector<8x16xf32>
    %32 = arith.mulf %23, %31 : vector<8x16xf32>
    %c0_20 = arith.constant 0 : index
    %c0_21 = arith.constant 0 : index
    %c0_22 = arith.constant 0 : index
    %33 = vector.load %arg18[%c0_20, %c0_21, %c0_22] : memref<8x16x8xf32, #tpu.memory_space<vmem>>, vector<1x16x8xf32>
    %34 = vector.shape_cast %33 : vector<1x16x8xf32> to vector<16x8xf32>
    %cst_23 = arith.constant dense<0.000000e+00> : vector<8x8xf32>
    %35 = tpu.matmul %32, %34, %cst_23 {dimension_numbers = #tpu.dot_dimension_numbers<[1], [0], [0], [1], [0, 0, 1, 1], [], []>} : vector<8x16xf32>, vector<16x8xf32>, vector<8x8xf32> -> vector<8x8xf32>
    %c0_24 = arith.constant 0 : index
    %c0_25 = arith.constant 0 : index
    %36 = vector.load %arg19[%c0_24, %c0_25] : memref<8x64xf32, #tpu.memory_space<vmem>>, vector<8x8xf32>
    tpu.vector_store %arg19[%c0_24, %c0_25], %35 {strides = array<i32>} : memref<8x64xf32, #tpu.memory_space<vmem>>, vector<8x8xf32>,
    %c1 = arith.constant 1 : index
    %c0_26 = arith.constant 0 : index
    %c0_27 = arith.constant 0 : index
    %37 = vector.load %arg6[%c1, %c0_26, %c0_27] : memref<8x64x8xf32, #tpu.memory_space<vmem>>, vector<1x64x8xf32>
    %38 = vector.shape_cast %37 : vector<1x64x8xf32> to vector<64x8xf32>
    %cst_28 = arith.constant dense<0.000000e+00> : vector<8x8xf32>
    %39 = tpu.matmul %4, %38, %cst_28 {dimension_numbers = #tpu.dot_dimension_numbers<[1], [0], [0], [1], [0, 0, 1, 1], [], []>} : vector<8x64xf32>, vector<64x8xf32>, vector<8x8xf32> -> vector<8x8xf32>
    %c1_29 = arith.constant 1 : index
    %c0_30 = arith.constant 0 : index
    %c0_31 = arith.constant 0 : index
    %40 = vector.load %arg10[%c1_29, %c0_30, %c0_31] : memref<8x1x8xf32, #tpu.memory_space<vmem>>, vector<1x1x8xf32>
    %41 = vector.shape_cast %40 : vector<1x1x8xf32> to vector<1x8xf32>
    %42 = vector.broadcast %41 : vector<1x8xf32> to vector<8x8xf32>
    %43 = arith.addf %39, %42 : vector<8x8xf32>
    %c8 = arith.constant 8 : index
    %c0_32 = arith.constant 0 : index
    %44 = vector.load %arg17[%c8, %c0_32] : memref<64x16xf32, #tpu.memory_space<vmem>>, vector<8x16xf32>
    %cst_33 = arith.constant dense<0.000000e+00> : vector<8x16xf32>
    %45 = tpu.matmul %43, %44, %cst_33 {dimension_numbers = #tpu.dot_dimension_numbers<[1], [0], [0], [1], [0, 0, 1, 1], [], []>} : vector<8x8xf32>, vector<8x16xf32>, vector<8x16xf32> -> vector<8x16xf32>
    %46 = vector.broadcast %6 : vector<1x16xf32> to vector<8x16xf32>
    %47 = arith.addf %45, %46 : vector<8x16xf32>
    %cst_34 = arith.constant dense<0xFF800000> : vector<8xf32>
    %48 = vector.multi_reduction <maximumf>, %47, %cst_34 [1] : vector<8x16xf32> to vector<8xf32>
    %49 = vector.shape_cast %48 : vector<8xf32> to vector<8x1xf32>
    %50 = vector.broadcast %49 : vector<8x1xf32> to vector<8x16xf32>
    %51 = arith.subf %47, %50 : vector<8x16xf32>
    %52 = math.exp %51 : vector<8x16xf32>
    %cst_35 = arith.constant dense<0.000000e+00> : vector<8xf32>
    %53 = vector.multi_reduction <add>, %52, %cst_35 [1] : vector<8x16xf32> to vector<8xf32>
    %54 = vector.shape_cast %53 : vector<8xf32> to vector<8x1xf32>
    %55 = tpu.reciprocal %54 {approx = true} : vector<8x1xf32> -> vector<8x1xf32>
    %56 = arith.mulf %54, %55 : vector<8x1xf32>
    %cst_36 = arith.constant 2.000000e+00 : f32
    %57 = vector.broadcast %cst_36 : f32 to vector<8x1xf32>
    %58 = arith.subf %57, %56 : vector<8x1xf32>
    %59 = arith.mulf %55, %58 : vector<8x1xf32>
    %60 = vector.broadcast %59 : vector<8x1xf32> to vector<8x16xf32>
    %61 = arith.mulf %52, %60 : vector<8x16xf32>
    %c1_37 = arith.constant 1 : index
    %c0_38 = arith.constant 0 : index
    %c0_39 = arith.constant 0 : index
    %62 = vector.load %arg18[%c1_37, %c0_38, %c0_39] : memref<8x16x8xf32, #tpu.memory_space<vmem>>, vector<1x16x8xf32>
    %63 = vector.shape_cast %62 : vector<1x16x8xf32> to vector<16x8xf32>
    %cst_40 = arith.constant dense<0.000000e+00> : vector<8x8xf32>
    %64 = tpu.matmul %61, %63, %cst_40 {dimension_numbers = #tpu.dot_dimension_numbers<[1], [0], [0], [1], [0, 0, 1, 1], [], []>} : vector<8x16xf32>, vector<16x8xf32>, vector<8x8xf32> -> vector<8x8xf32>
    %c0_41 = arith.constant 0 : index
    %c8_42 = arith.constant 8 : index
    %65 = vector.load %arg19[%c0_41, %c8_42] : memref<8x64xf32, #tpu.memory_space<vmem>>, vector<8x8xf32>
    tpu.vector_store %arg19[%c0_41, %c8_42], %64 {strides = array<i32>} : memref<8x64xf32, #tpu.memory_space<vmem>>, vector<8x8xf32>,
    %c2 = arith.constant 2 : index
    %c0_43 = arith.constant 0 : index
    %c0_44 = arith.constant 0 : index
    %66 = vector.load %arg6[%c2, %c0_43, %c0_44] : memref<8x64x8xf32, #tpu.memory_space<vmem>>, vector<1x64x8xf32>
    %67 = vector.shape_cast %66 : vector<1x64x8xf32> to vector<64x8xf32>
    %cst_45 = arith.constant dense<0.000000e+00> : vector<8x8xf32>
    %68 = tpu.matmul %4, %67, %cst_45 {dimension_numbers = #tpu.dot_dimension_numbers<[1], [0], [0], [1], [0, 0, 1, 1], [], []>} : vector<8x64xf32>, vector<64x8xf32>, vector<8x8xf32> -> vector<8x8xf32>
    %c2_46 = arith.constant 2 : index
    %c0_47 = arith.constant 0 : index
    %c0_48 = arith.constant 0 : index
    %69 = vector.load %arg10[%c2_46, %c0_47, %c0_48] : memref<8x1x8xf32, #tpu.memory_space<vmem>>, vector<1x1x8xf32>
    %70 = vector.shape_cast %69 : vector<1x1x8xf32> to vector<1x8xf32>
    %71 = vector.broadcast %70 : vector<1x8xf32> to vector<8x8xf32>
    %72 = arith.addf %68, %71 : vector<8x8xf32>
    %c16 = arith.constant 16 : index
    %c0_49 = arith.constant 0 : index
    %73 = vector.load %arg17[%c16, %c0_49] : memref<64x16xf32, #tpu.memory_space<vmem>>, vector<8x16xf32>
    %cst_50 = arith.constant dense<0.000000e+00> : vector<8x16xf32>
    %74 = tpu.matmul %72, %73, %cst_50 {dimension_numbers = #tpu.dot_dimension_numbers<[1], [0], [0], [1], [0, 0, 1, 1], [], []>} : vector<8x8xf32>, vector<8x16xf32>, vector<8x16xf32> -> vector<8x16xf32>
    %75 = vector.broadcast %6 : vector<1x16xf32> to vector<8x16xf32>
    %76 = arith.addf %74, %75 : vector<8x16xf32>
    %cst_51 = arith.constant dense<0xFF800000> : vector<8xf32>
    %77 = vector.multi_reduction <maximumf>, %76, %cst_51 [1] : vector<8x16xf32> to vector<8xf32>
    %78 = vector.shape_cast %77 : vector<8xf32> to vector<8x1xf32>
    %79 = vector.broadcast %78 : vector<8x1xf32> to vector<8x16xf32>
    %80 = arith.subf %76, %79 : vector<8x16xf32>
    %81 = math.exp %80 : vector<8x16xf32>
    %cst_52 = arith.constant dense<0.000000e+00> : vector<8xf32>
    %82 = vector.multi_reduction <add>, %81, %cst_52 [1] : vector<8x16xf32> to vector<8xf32>
    %83 = vector.shape_cast %82 : vector<8xf32> to vector<8x1xf32>
    %84 = tpu.reciprocal %83 {approx = true} : vector<8x1xf32> -> vector<8x1xf32>
    %85 = arith.mulf %83, %84 : vector<8x1xf32>
    %cst_53 = arith.constant 2.000000e+00 : f32
    %86 = vector.broadcast %cst_53 : f32 to vector<8x1xf32>
    %87 = arith.subf %86, %85 : vector<8x1xf32>
    %88 = arith.mulf %84, %87 : vector<8x1xf32>
    %89 = vector.broadcast %88 : vector<8x1xf32> to vector<8x16xf32>
    %90 = arith.mulf %81, %89 : vector<8x16xf32>
    %c2_54 = arith.constant 2 : index
    %c0_55 = arith.constant 0 : index
    %c0_56 = arith.constant 0 : index
    %91 = vector.load %arg18[%c2_54, %c0_55, %c0_56] : memref<8x16x8xf32, #tpu.memory_space<vmem>>, vector<1x16x8xf32>
    %92 = vector.shape_cast %91 : vector<1x16x8xf32> to vector<16x8xf32>
    %cst_57 = arith.constant dense<0.000000e+00> : vector<8x8xf32>
    %93 = tpu.matmul %90, %92, %cst_57 {dimension_numbers = #tpu.dot_dimension_numbers<[1], [0], [0], [1], [0, 0, 1, 1], [], []>} : vector<8x16xf32>, vector<16x8xf32>, vector<8x8xf32> -> vector<8x8xf32>
    %c0_58 = arith.constant 0 : index
    %c16_59 = arith.constant 16 : index
    %94 = vector.load %arg19[%c0_58, %c16_59] : memref<8x64xf32, #tpu.memory_space<vmem>>, vector<8x8xf32>
    tpu.vector_store %arg19[%c0_58, %c16_59], %93 {strides = array<i32>} : memref<8x64xf32, #tpu.memory_space<vmem>>, vector<8x8xf32>,
    %c3 = arith.constant 3 : index
    %c0_60 = arith.constant 0 : index
    %c0_61 = arith.constant 0 : index
    %95 = vector.load %arg6[%c3, %c0_60, %c0_61] : memref<8x64x8xf32, #tpu.memory_space<vmem>>, vector<1x64x8xf32>
    %96 = vector.shape_cast %95 : vector<1x64x8xf32> to vector<64x8xf32>
    %cst_62 = arith.constant dense<0.000000e+00> : vector<8x8xf32>
    %97 = tpu.matmul %4, %96, %cst_62 {dimension_numbers = #tpu.dot_dimension_numbers<[1], [0], [0], [1], [0, 0, 1, 1], [], []>} : vector<8x64xf32>, vector<64x8xf32>, vector<8x8xf32> -> vector<8x8xf32>
    %c3_63 = arith.constant 3 : index
    %c0_64 = arith.constant 0 : index
    %c0_65 = arith.constant 0 : index
    %98 = vector.load %arg10[%c3_63, %c0_64, %c0_65] : memref<8x1x8xf32, #tpu.memory_space<vmem>>, vector<1x1x8xf32>
    %99 = vector.shape_cast %98 : vector<1x1x8xf32> to vector<1x8xf32>
    %100 = vector.broadcast %99 : vector<1x8xf32> to vector<8x8xf32>
    %101 = arith.addf %97, %100 : vector<8x8xf32>
    %c24 = arith.constant 24 : index
    %c0_66 = arith.constant 0 : index
    %102 = vector.load %arg17[%c24, %c0_66] : memref<64x16xf32, #tpu.memory_space<vmem>>, vector<8x16xf32>
    %cst_67 = arith.constant dense<0.000000e+00> : vector<8x16xf32>
    %103 = tpu.matmul %101, %102, %cst_67 {dimension_numbers = #tpu.dot_dimension_numbers<[1], [0], [0], [1], [0, 0, 1, 1], [], []>} : vector<8x8xf32>, vector<8x16xf32>, vector<8x16xf32> -> vector<8x16xf32>
    %104 = vector.broadcast %6 : vector<1x16xf32> to vector<8x16xf32>
    %105 = arith.addf %103, %104 : vector<8x16xf32>
    %cst_68 = arith.constant dense<0xFF800000> : vector<8xf32>
    %106 = vector.multi_reduction <maximumf>, %105, %cst_68 [1] : vector<8x16xf32> to vector<8xf32>
    %107 = vector.shape_cast %106 : vector<8xf32> to vector<8x1xf32>
    %108 = vector.broadcast %107 : vector<8x1xf32> to vector<8x16xf32>
    %109 = arith.subf %105, %108 : vector<8x16xf32>
    %110 = math.exp %109 : vector<8x16xf32>
    %cst_69 = arith.constant dense<0.000000e+00> : vector<8xf32>
    %111 = vector.multi_reduction <add>, %110, %cst_69 [1] : vector<8x16xf32> to vector<8xf32>
    %112 = vector.shape_cast %111 : vector<8xf32> to vector<8x1xf32>
    %113 = tpu.reciprocal %112 {approx = true} : vector<8x1xf32> -> vector<8x1xf32>
    %114 = arith.mulf %112, %113 : vector<8x1xf32>
    %cst_70 = arith.constant 2.000000e+00 : f32
    %115 = vector.broadcast %cst_70 : f32 to vector<8x1xf32>
    %116 = arith.subf %115, %114 : vector<8x1xf32>
    %117 = arith.mulf %113, %116 : vector<8x1xf32>
    %118 = vector.broadcast %117 : vector<8x1xf32> to vector<8x16xf32>
    %119 = arith.mulf %110, %118 : vector<8x16xf32>
    %c3_71 = arith.constant 3 : index
    %c0_72 = arith.constant 0 : index
    %c0_73 = arith.constant 0 : index
    %120 = vector.load %arg18[%c3_71, %c0_72, %c0_73] : memref<8x16x8xf32, #tpu.memory_space<vmem>>, vector<1x16x8xf32>
    %121 = vector.shape_cast %120 : vector<1x16x8xf32> to vector<16x8xf32>
    %cst_74 = arith.constant dense<0.000000e+00> : vector<8x8xf32>
    %122 = tpu.matmul %119, %121, %cst_74 {dimension_numbers = #tpu.dot_dimension_numbers<[1], [0], [0], [1], [0, 0, 1, 1], [], []>} : vector<8x16xf32>, vector<16x8xf32>, vector<8x8xf32> -> vector<8x8xf32>
    %c0_75 = arith.constant 0 : index
    %c24_76 = arith.constant 24 : index
    %123 = vector.load %arg19[%c0_75, %c24_76] : memref<8x64xf32, #tpu.memory_space<vmem>>, vector<8x8xf32>
    tpu.vector_store %arg19[%c0_75, %c24_76], %122 {strides = array<i32>} : memref<8x64xf32, #tpu.memory_space<vmem>>, vector<8x8xf32>,
    %c4 = arith.constant 4 : index
    %c0_77 = arith.constant 0 : index
    %c0_78 = arith.constant 0 : index
    %124 = vector.load %arg6[%c4, %c0_77, %c0_78] : memref<8x64x8xf32, #tpu.memory_space<vmem>>, vector<1x64x8xf32>
    %125 = vector.shape_cast %124 : vector<1x64x8xf32> to vector<64x8xf32>
    %cst_79 = arith.constant dense<0.000000e+00> : vector<8x8xf32>
    %126 = tpu.matmul %4, %125, %cst_79 {dimension_numbers = #tpu.dot_dimension_numbers<[1], [0], [0], [1], [0, 0, 1, 1], [], []>} : vector<8x64xf32>, vector<64x8xf32>, vector<8x8xf32> -> vector<8x8xf32>
    %c4_80 = arith.constant 4 : index
    %c0_81 = arith.constant 0 : index
    %c0_82 = arith.constant 0 : index
    %127 = vector.load %arg10[%c4_80, %c0_81, %c0_82] : memref<8x1x8xf32, #tpu.memory_space<vmem>>, vector<1x1x8xf32>
    %128 = vector.shape_cast %127 : vector<1x1x8xf32> to vector<1x8xf32>
    %129 = vector.broadcast %128 : vector<1x8xf32> to vector<8x8xf32>
    %130 = arith.addf %126, %129 : vector<8x8xf32>
    %c32 = arith.constant 32 : index
    %c0_83 = arith.constant 0 : index
    %131 = vector.load %arg17[%c32, %c0_83] : memref<64x16xf32, #tpu.memory_space<vmem>>, vector<8x16xf32>
    %cst_84 = arith.constant dense<0.000000e+00> : vector<8x16xf32>
    %132 = tpu.matmul %130, %131, %cst_84 {dimension_numbers = #tpu.dot_dimension_numbers<[1], [0], [0], [1], [0, 0, 1, 1], [], []>} : vector<8x8xf32>, vector<8x16xf32>, vector<8x16xf32> -> vector<8x16xf32>
    %133 = vector.broadcast %6 : vector<1x16xf32> to vector<8x16xf32>
    %134 = arith.addf %132, %133 : vector<8x16xf32>
    %cst_85 = arith.constant dense<0xFF800000> : vector<8xf32>
    %135 = vector.multi_reduction <maximumf>, %134, %cst_85 [1] : vector<8x16xf32> to vector<8xf32>
    %136 = vector.shape_cast %135 : vector<8xf32> to vector<8x1xf32>
    %137 = vector.broadcast %136 : vector<8x1xf32> to vector<8x16xf32>
    %138 = arith.subf %134, %137 : vector<8x16xf32>
    %139 = math.exp %138 : vector<8x16xf32>
    %cst_86 = arith.constant dense<0.000000e+00> : vector<8xf32>
    %140 = vector.multi_reduction <add>, %139, %cst_86 [1] : vector<8x16xf32> to vector<8xf32>
    %141 = vector.shape_cast %140 : vector<8xf32> to vector<8x1xf32>
    %142 = tpu.reciprocal %141 {approx = true} : vector<8x1xf32> -> vector<8x1xf32>
    %143 = arith.mulf %141, %142 : vector<8x1xf32>
    %cst_87 = arith.constant 2.000000e+00 : f32
    %144 = vector.broadcast %cst_87 : f32 to vector<8x1xf32>
    %145 = arith.subf %144, %143 : vector<8x1xf32>
    %146 = arith.mulf %142, %145 : vector<8x1xf32>
    %147 = vector.broadcast %146 : vector<8x1xf32> to vector<8x16xf32>
    %148 = arith.mulf %139, %147 : vector<8x16xf32>
    %c4_88 = arith.constant 4 : index
    %c0_89 = arith.constant 0 : index
    %c0_90 = arith.constant 0 : index
    %149 = vector.load %arg18[%c4_88, %c0_89, %c0_90] : memref<8x16x8xf32, #tpu.memory_space<vmem>>, vector<1x16x8xf32>
    %150 = vector.shape_cast %149 : vector<1x16x8xf32> to vector<16x8xf32>
    %cst_91 = arith.constant dense<0.000000e+00> : vector<8x8xf32>
    %151 = tpu.matmul %148, %150, %cst_91 {dimension_numbers = #tpu.dot_dimension_numbers<[1], [0], [0], [1], [0, 0, 1, 1], [], []>} : vector<8x16xf32>, vector<16x8xf32>, vector<8x8xf32> -> vector<8x8xf32>
    %c0_92 = arith.constant 0 : index
    %c32_93 = arith.constant 32 : index
    %152 = vector.load %arg19[%c0_92, %c32_93] : memref<8x64xf32, #tpu.memory_space<vmem>>, vector<8x8xf32>
    tpu.vector_store %arg19[%c0_92, %c32_93], %151 {strides = array<i32>} : memref<8x64xf32, #tpu.memory_space<vmem>>, vector<8x8xf32>,
    %c5 = arith.constant 5 : index
    %c0_94 = arith.constant 0 : index
    %c0_95 = arith.constant 0 : index
    %153 = vector.load %arg6[%c5, %c0_94, %c0_95] : memref<8x64x8xf32, #tpu.memory_space<vmem>>, vector<1x64x8xf32>
    %154 = vector.shape_cast %153 : vector<1x64x8xf32> to vector<64x8xf32>
    %cst_96 = arith.constant dense<0.000000e+00> : vector<8x8xf32>
    %155 = tpu.matmul %4, %154, %cst_96 {dimension_numbers = #tpu.dot_dimension_numbers<[1], [0], [0], [1], [0, 0, 1, 1], [], []>} : vector<8x64xf32>, vector<64x8xf32>, vector<8x8xf32> -> vector<8x8xf32>
    %c5_97 = arith.constant 5 : index
    %c0_98 = arith.constant 0 : index
    %c0_99 = arith.constant 0 : index
    %156 = vector.load %arg10[%c5_97, %c0_98, %c0_99] : memref<8x1x8xf32, #tpu.memory_space<vmem>>, vector<1x1x8xf32>
    %157 = vector.shape_cast %156 : vector<1x1x8xf32> to vector<1x8xf32>
    %158 = vector.broadcast %157 : vector<1x8xf32> to vector<8x8xf32>
    %159 = arith.addf %155, %158 : vector<8x8xf32>
    %c40 = arith.constant 40 : index
    %c0_100 = arith.constant 0 : index
    %160 = vector.load %arg17[%c40, %c0_100] : memref<64x16xf32, #tpu.memory_space<vmem>>, vector<8x16xf32>
    %cst_101 = arith.constant dense<0.000000e+00> : vector<8x16xf32>
    %161 = tpu.matmul %159, %160, %cst_101 {dimension_numbers = #tpu.dot_dimension_numbers<[1], [0], [0], [1], [0, 0, 1, 1], [], []>} : vector<8x8xf32>, vector<8x16xf32>, vector<8x16xf32> -> vector<8x16xf32>
    %162 = vector.broadcast %6 : vector<1x16xf32> to vector<8x16xf32>
    %163 = arith.addf %161, %162 : vector<8x16xf32>
    %cst_102 = arith.constant dense<0xFF800000> : vector<8xf32>
    %164 = vector.multi_reduction <maximumf>, %163, %cst_102 [1] : vector<8x16xf32> to vector<8xf32>
    %165 = vector.shape_cast %164 : vector<8xf32> to vector<8x1xf32>
    %166 = vector.broadcast %165 : vector<8x1xf32> to vector<8x16xf32>
    %167 = arith.subf %163, %166 : vector<8x16xf32>
    %168 = math.exp %167 : vector<8x16xf32>
    %cst_103 = arith.constant dense<0.000000e+00> : vector<8xf32>
    %169 = vector.multi_reduction <add>, %168, %cst_103 [1] : vector<8x16xf32> to vector<8xf32>
    %170 = vector.shape_cast %169 : vector<8xf32> to vector<8x1xf32>
    %171 = tpu.reciprocal %170 {approx = true} : vector<8x1xf32> -> vector<8x1xf32>
    %172 = arith.mulf %170, %171 : vector<8x1xf32>
    %cst_104 = arith.constant 2.000000e+00 : f32
    %173 = vector.broadcast %cst_104 : f32 to vector<8x1xf32>
    %174 = arith.subf %173, %172 : vector<8x1xf32>
    %175 = arith.mulf %171, %174 : vector<8x1xf32>
    %176 = vector.broadcast %175 : vector<8x1xf32> to vector<8x16xf32>
    %177 = arith.mulf %168, %176 : vector<8x16xf32>
    %c5_105 = arith.constant 5 : index
    %c0_106 = arith.constant 0 : index
    %c0_107 = arith.constant 0 : index
    %178 = vector.load %arg18[%c5_105, %c0_106, %c0_107] : memref<8x16x8xf32, #tpu.memory_space<vmem>>, vector<1x16x8xf32>
    %179 = vector.shape_cast %178 : vector<1x16x8xf32> to vector<16x8xf32>
    %cst_108 = arith.constant dense<0.000000e+00> : vector<8x8xf32>
    %180 = tpu.matmul %177, %179, %cst_108 {dimension_numbers = #tpu.dot_dimension_numbers<[1], [0], [0], [1], [0, 0, 1, 1], [], []>} : vector<8x16xf32>, vector<16x8xf32>, vector<8x8xf32> -> vector<8x8xf32>
    %c0_109 = arith.constant 0 : index
    %c40_110 = arith.constant 40 : index
    %181 = vector.load %arg19[%c0_109, %c40_110] : memref<8x64xf32, #tpu.memory_space<vmem>>, vector<8x8xf32>
    tpu.vector_store %arg19[%c0_109, %c40_110], %180 {strides = array<i32>} : memref<8x64xf32, #tpu.memory_space<vmem>>, vector<8x8xf32>,
    %c6 = arith.constant 6 : index
    %c0_111 = arith.constant 0 : index
    %c0_112 = arith.constant 0 : index
    %182 = vector.load %arg6[%c6, %c0_111, %c0_112] : memref<8x64x8xf32, #tpu.memory_space<vmem>>, vector<1x64x8xf32>
    %183 = vector.shape_cast %182 : vector<1x64x8xf32> to vector<64x8xf32>
    %cst_113 = arith.constant dense<0.000000e+00> : vector<8x8xf32>
    %184 = tpu.matmul %4, %183, %cst_113 {dimension_numbers = #tpu.dot_dimension_numbers<[1], [0], [0], [1], [0, 0, 1, 1], [], []>} : vector<8x64xf32>, vector<64x8xf32>, vector<8x8xf32> -> vector<8x8xf32>
    %c6_114 = arith.constant 6 : index
    %c0_115 = arith.constant 0 : index
    %c0_116 = arith.constant 0 : index
    %185 = vector.load %arg10[%c6_114, %c0_115, %c0_116] : memref<8x1x8xf32, #tpu.memory_space<vmem>>, vector<1x1x8xf32>
    %186 = vector.shape_cast %185 : vector<1x1x8xf32> to vector<1x8xf32>
    %187 = vector.broadcast %186 : vector<1x8xf32> to vector<8x8xf32>
    %188 = arith.addf %184, %187 : vector<8x8xf32>
    %c48 = arith.constant 48 : index
    %c0_117 = arith.constant 0 : index
    %189 = vector.load %arg17[%c48, %c0_117] : memref<64x16xf32, #tpu.memory_space<vmem>>, vector<8x16xf32>
    %cst_118 = arith.constant dense<0.000000e+00> : vector<8x16xf32>
    %190 = tpu.matmul %188, %189, %cst_118 {dimension_numbers = #tpu.dot_dimension_numbers<[1], [0], [0], [1], [0, 0, 1, 1], [], []>} : vector<8x8xf32>, vector<8x16xf32>, vector<8x16xf32> -> vector<8x16xf32>
    %191 = vector.broadcast %6 : vector<1x16xf32> to vector<8x16xf32>
    %192 = arith.addf %190, %191 : vector<8x16xf32>
    %cst_119 = arith.constant dense<0xFF800000> : vector<8xf32>
    %193 = vector.multi_reduction <maximumf>, %192, %cst_119 [1] : vector<8x16xf32> to vector<8xf32>
    %194 = vector.shape_cast %193 : vector<8xf32> to vector<8x1xf32>
    %195 = vector.broadcast %194 : vector<8x1xf32> to vector<8x16xf32>
    %196 = arith.subf %192, %195 : vector<8x16xf32>
    %197 = math.exp %196 : vector<8x16xf32>
    %cst_120 = arith.constant dense<0.000000e+00> : vector<8xf32>
    %198 = vector.multi_reduction <add>, %197, %cst_120 [1] : vector<8x16xf32> to vector<8xf32>
    %199 = vector.shape_cast %198 : vector<8xf32> to vector<8x1xf32>
    %200 = tpu.reciprocal %199 {approx = true} : vector<8x1xf32> -> vector<8x1xf32>
    %201 = arith.mulf %199, %200 : vector<8x1xf32>
    %cst_121 = arith.constant 2.000000e+00 : f32
    %202 = vector.broadcast %cst_121 : f32 to vector<8x1xf32>
    %203 = arith.subf %202, %201 : vector<8x1xf32>
    %204 = arith.mulf %200, %203 : vector<8x1xf32>
    %205 = vector.broadcast %204 : vector<8x1xf32> to vector<8x16xf32>
    %206 = arith.mulf %197, %205 : vector<8x16xf32>
    %c6_122 = arith.constant 6 : index
    %c0_123 = arith.constant 0 : index
    %c0_124 = arith.constant 0 : index
    %207 = vector.load %arg18[%c6_122, %c0_123, %c0_124] : memref<8x16x8xf32, #tpu.memory_space<vmem>>, vector<1x16x8xf32>
    %208 = vector.shape_cast %207 : vector<1x16x8xf32> to vector<16x8xf32>
    %cst_125 = arith.constant dense<0.000000e+00> : vector<8x8xf32>
    %209 = tpu.matmul %206, %208, %cst_125 {dimension_numbers = #tpu.dot_dimension_numbers<[1], [0], [0], [1], [0, 0, 1, 1], [], []>} : vector<8x16xf32>, vector<16x8xf32>, vector<8x8xf32> -> vector<8x8xf32>
    %c0_126 = arith.constant 0 : index
    %c48_127 = arith.constant 48 : index
    %210 = vector.load %arg19[%c0_126, %c48_127] : memref<8x64xf32, #tpu.memory_space<vmem>>, vector<8x8xf32>
    tpu.vector_store %arg19[%c0_126, %c48_127], %209 {strides = array<i32>} : memref<8x64xf32, #tpu.memory_space<vmem>>, vector<8x8xf32>,
    %c7 = arith.constant 7 : index
    %c0_128 = arith.constant 0 : index
    %c0_129 = arith.constant 0 : index
    %211 = vector.load %arg6[%c7, %c0_128, %c0_129] : memref<8x64x8xf32, #tpu.memory_space<vmem>>, vector<1x64x8xf32>
    %212 = vector.shape_cast %211 : vector<1x64x8xf32> to vector<64x8xf32>
    %cst_130 = arith.constant dense<0.000000e+00> : vector<8x8xf32>
    %213 = tpu.matmul %4, %212, %cst_130 {dimension_numbers = #tpu.dot_dimension_numbers<[1], [0], [0], [1], [0, 0, 1, 1], [], []>} : vector<8x64xf32>, vector<64x8xf32>, vector<8x8xf32> -> vector<8x8xf32>
    %c7_131 = arith.constant 7 : index
    %c0_132 = arith.constant 0 : index
    %c0_133 = arith.constant 0 : index
    %214 = vector.load %arg10[%c7_131, %c0_132, %c0_133] : memref<8x1x8xf32, #tpu.memory_space<vmem>>, vector<1x1x8xf32>
    %215 = vector.shape_cast %214 : vector<1x1x8xf32> to vector<1x8xf32>
    %216 = vector.broadcast %215 : vector<1x8xf32> to vector<8x8xf32>
    %217 = arith.addf %213, %216 : vector<8x8xf32>
    %c56 = arith.constant 56 : index
    %c0_134 = arith.constant 0 : index
    %218 = vector.load %arg17[%c56, %c0_134] : memref<64x16xf32, #tpu.memory_space<vmem>>, vector<8x16xf32>
    %cst_135 = arith.constant dense<0.000000e+00> : vector<8x16xf32>
    %219 = tpu.matmul %217, %218, %cst_135 {dimension_numbers = #tpu.dot_dimension_numbers<[1], [0], [0], [1], [0, 0, 1, 1], [], []>} : vector<8x8xf32>, vector<8x16xf32>, vector<8x16xf32> -> vector<8x16xf32>
    %220 = vector.broadcast %6 : vector<1x16xf32> to vector<8x16xf32>
    %221 = arith.addf %219, %220 : vector<8x16xf32>
    %cst_136 = arith.constant dense<0xFF800000> : vector<8xf32>
    %222 = vector.multi_reduction <maximumf>, %221, %cst_136 [1] : vector<8x16xf32> to vector<8xf32>
    %223 = vector.shape_cast %222 : vector<8xf32> to vector<8x1xf32>
    %224 = vector.broadcast %223 : vector<8x1xf32> to vector<8x16xf32>
    %225 = arith.subf %221, %224 : vector<8x16xf32>
    %226 = math.exp %225 : vector<8x16xf32>
    %cst_137 = arith.constant dense<0.000000e+00> : vector<8xf32>
    %227 = vector.multi_reduction <add>, %226, %cst_137 [1] : vector<8x16xf32> to vector<8xf32>
    %228 = vector.shape_cast %227 : vector<8xf32> to vector<8x1xf32>
    %229 = tpu.reciprocal %228 {approx = true} : vector<8x1xf32> -> vector<8x1xf32>
    %230 = arith.mulf %228, %229 : vector<8x1xf32>
    %cst_138 = arith.constant 2.000000e+00 : f32
    %231 = vector.broadcast %cst_138 : f32 to vector<8x1xf32>
    %232 = arith.subf %231, %230 : vector<8x1xf32>
    %233 = arith.mulf %229, %232 : vector<8x1xf32>
    %234 = vector.broadcast %233 : vector<8x1xf32> to vector<8x16xf32>
    %235 = arith.mulf %226, %234 : vector<8x16xf32>
    %c7_139 = arith.constant 7 : index
    %c0_140 = arith.constant 0 : index
    %c0_141 = arith.constant 0 : index
    %236 = vector.load %arg18[%c7_139, %c0_140, %c0_141] : memref<8x16x8xf32, #tpu.memory_space<vmem>>, vector<1x16x8xf32>
    %237 = vector.shape_cast %236 : vector<1x16x8xf32> to vector<16x8xf32>
    %cst_142 = arith.constant dense<0.000000e+00> : vector<8x8xf32>
    %238 = tpu.matmul %235, %237, %cst_142 {dimension_numbers = #tpu.dot_dimension_numbers<[1], [0], [0], [1], [0, 0, 1, 1], [], []>} : vector<8x16xf32>, vector<16x8xf32>, vector<8x8xf32> -> vector<8x8xf32>
    %c0_143 = arith.constant 0 : index
    %c56_144 = arith.constant 56 : index
    %239 = vector.load %arg19[%c0_143, %c56_144] : memref<8x64xf32, #tpu.memory_space<vmem>>, vector<8x8xf32>
    tpu.vector_store %arg19[%c0_143, %c56_144], %238 {strides = array<i32>} : memref<8x64xf32, #tpu.memory_space<vmem>>, vector<8x8xf32>,
    %c0_145 = arith.constant 0 : index
    %c0_146 = arith.constant 0 : index
    %240 = vector.load %arg19[%c0_145, %c0_146] : memref<8x64xf32, #tpu.memory_space<vmem>>, vector<8x64xf32>
    %c0_147 = arith.constant 0 : index
    %c0_148 = arith.constant 0 : index
    %241 = vector.load %arg9[%c0_147, %c0_148] : memref<64x64xf32, #tpu.memory_space<vmem>>, vector<64x64xf32>
    %cst_149 = arith.constant dense<0.000000e+00> : vector<8x64xf32>
    %242 = tpu.matmul %240, %241, %cst_149 {dimension_numbers = #tpu.dot_dimension_numbers<[1], [0], [0], [1], [0, 0, 1, 1], [], []>} : vector<8x64xf32>, vector<64x64xf32>, vector<8x64xf32> -> vector<8x64xf32>
    %243 = vector.extract_strided_slice %7 {offsets = [1, 0], sizes = [1, 64], strides = [1, 1]} : vector<8x64xf32> to vector<1x64xf32>
    %244 = vector.broadcast %243 : vector<1x64xf32> to vector<8x64xf32>
    %245 = arith.addf %242, %244 : vector<8x64xf32>
    %246 = arith.addf %4, %245 : vector<8x64xf32>
    %247 = vector.extract_strided_slice %7 {offsets = [2, 0], sizes = [1, 64], strides = [1, 1]} : vector<8x64xf32> to vector<1x64xf32>
    %248 = vector.extract_strided_slice %7 {offsets = [3, 0], sizes = [1, 64], strides = [1, 1]} : vector<8x64xf32> to vector<1x64xf32>
    %cst_150 = arith.constant dense<0.000000e+00> : vector<8xf32>
    %249 = vector.multi_reduction <add>, %246, %cst_150 [1] : vector<8x64xf32> to vector<8xf32>
    %250 = vector.shape_cast %249 : vector<8xf32> to vector<8x1xf32>
    %cst_151 = arith.constant 6.400000e+01 : f32
    %251 = vector.broadcast %cst_151 : f32 to vector<8x1xf32>
    %252 = arith.divf %250, %251 : vector<8x1xf32>
    %253 = vector.broadcast %252 : vector<8x1xf32> to vector<8x64xf32>
    %254 = arith.subf %246, %253 : vector<8x64xf32>
    %255 = arith.mulf %254, %254 : vector<8x64xf32>
    %cst_152 = arith.constant dense<0.000000e+00> : vector<8xf32>
    %256 = vector.multi_reduction <add>, %255, %cst_152 [1] : vector<8x64xf32> to vector<8xf32>
    %257 = vector.shape_cast %256 : vector<8xf32> to vector<8x1xf32>
    %cst_153 = arith.constant 6.400000e+01 : f32
    %258 = vector.broadcast %cst_153 : f32 to vector<8x1xf32>
    %259 = arith.divf %257, %258 : vector<8x1xf32>
    %cst_154 = arith.constant 9.99999974E-6 : f32
    %260 = vector.broadcast %cst_154 : f32 to vector<8x1xf32>
    %261 = arith.addf %259, %260 : vector<8x1xf32>
    %262 = math.rsqrt %261 : vector<8x1xf32>
    %263 = vector.broadcast %262 : vector<8x1xf32> to vector<8x64xf32>
    %264 = arith.mulf %254, %263 : vector<8x64xf32>
    %265 = vector.broadcast %247 : vector<1x64xf32> to vector<8x64xf32>
    %266 = arith.mulf %264, %265 : vector<8x64xf32>
    %267 = vector.broadcast %248 : vector<1x64xf32> to vector<8x64xf32>
    %268 = arith.addf %266, %267 : vector<8x64xf32>
    %c0_155 = arith.constant 0 : index
    %c0_156 = arith.constant 0 : index
    %269 = vector.load %arg13[%c0_155, %c0_156] : memref<64x256xf32, #tpu.memory_space<vmem>>, vector<64x256xf32>
    %cst_157 = arith.constant dense<0.000000e+00> : vector<8x256xf32>
    %270 = tpu.matmul %268, %269, %cst_157 {dimension_numbers = #tpu.dot_dimension_numbers<[1], [0], [0], [1], [0, 0, 1, 1], [], []>} : vector<8x64xf32>, vector<64x256xf32>, vector<8x256xf32> -> vector<8x256xf32>
    %c0_158 = arith.constant 0 : index
    %c0_159 = arith.constant 0 : index
    %271 = vector.load %arg14[%c0_158, %c0_159] : memref<1x256xf32, #tpu.memory_space<vmem>>, vector<1x256xf32>
    %272 = vector.broadcast %271 : vector<1x256xf32> to vector<8x256xf32>
    %273 = arith.addf %270, %272 : vector<8x256xf32>
    %cst_160 = arith.constant 5.000000e-01 : f32
    %274 = vector.broadcast %cst_160 : f32 to vector<8x256xf32>
    %275 = arith.mulf %274, %273 : vector<8x256xf32>
    %cst_161 = arith.constant 0.707106769 : f32
    %276 = vector.broadcast %cst_161 : f32 to vector<8x256xf32>
    %277 = arith.mulf %273, %276 : vector<8x256xf32>
    %cst_162 = arith.constant 0.000000e+00 : f32
    %278 = vector.broadcast %cst_162 : f32 to vector<8x256xf32>
    %279 = arith.cmpf oge, %277, %278 : vector<8x256xf32>
    %cst_163 = arith.constant 1.000000e+00 : f32
    %cst_164 = arith.constant -1.000000e+00 : f32
    %280 = vector.broadcast %cst_163 : f32 to vector<8x256xf32>
    %281 = vector.broadcast %cst_164 : f32 to vector<8x256xf32>
    %282 = arith.select %279, %280, %281 : vector<8x256xi1>, vector<8x256xf32>
    %283 = math.absf %277 : vector<8x256xf32>
    %cst_165 = arith.constant 0.327591091 : f32
    %284 = vector.broadcast %cst_165 : f32 to vector<8x256xf32>
    %285 = arith.mulf %284, %283 : vector<8x256xf32>
    %cst_166 = arith.constant 1.000000e+00 : f32
    %286 = vector.broadcast %cst_166 : f32 to vector<8x256xf32>
    %287 = arith.addf %286, %285 : vector<8x256xf32>
    %288 = tpu.reciprocal %287 {approx = true} : vector<8x256xf32> -> vector<8x256xf32>
    %289 = arith.mulf %287, %288 : vector<8x256xf32>
    %cst_167 = arith.constant 2.000000e+00 : f32
    %290 = vector.broadcast %cst_167 : f32 to vector<8x256xf32>
    %291 = arith.subf %290, %289 : vector<8x256xf32>
    %292 = arith.mulf %288, %291 : vector<8x256xf32>
    %cst_168 = arith.constant 1.06140542 : f32
    %293 = vector.broadcast %cst_168 : f32 to vector<8x256xf32>
    %294 = arith.mulf %293, %292 : vector<8x256xf32>
    %cst_169 = arith.constant -1.45315206 : f32
    %295 = vector.broadcast %cst_169 : f32 to vector<8x256xf32>
    %296 = arith.addf %294, %295 : vector<8x256xf32>
    %297 = arith.mulf %296, %292 : vector<8x256xf32>
    %cst_170 = arith.constant 1.42141378 : f32
    %298 = vector.broadcast %cst_170 : f32 to vector<8x256xf32>
    %299 = arith.addf %297, %298 : vector<8x256xf32>
    %300 = arith.mulf %299, %292 : vector<8x256xf32>
    %cst_171 = arith.constant -0.284496725 : f32
    %301 = vector.broadcast %cst_171 : f32 to vector<8x256xf32>
    %302 = arith.addf %300, %301 : vector<8x256xf32>
    %303 = arith.mulf %302, %292 : vector<8x256xf32>
    %cst_172 = arith.constant 0.254829586 : f32
    %304 = vector.broadcast %cst_172 : f32 to vector<8x256xf32>
    %305 = arith.addf %303, %304 : vector<8x256xf32>
    %306 = arith.mulf %305, %292 : vector<8x256xf32>
    %cst_173 = arith.constant 0.000000e+00 : f32
    %307 = vector.broadcast %cst_173 : f32 to vector<8x256xf32>
    %308 = arith.subf %307, %283 : vector<8x256xf32>
    %309 = arith.mulf %308, %283 : vector<8x256xf32>
    %310 = math.exp %309 : vector<8x256xf32>
    %311 = arith.mulf %306, %310 : vector<8x256xf32>
    %cst_174 = arith.constant 1.000000e+00 : f32
    %312 = vector.broadcast %cst_174 : f32 to vector<8x256xf32>
    %313 = arith.subf %312, %311 : vector<8x256xf32>
    %314 = arith.mulf %282, %313 : vector<8x256xf32>
    %cst_175 = arith.constant 1.000000e+00 : f32
    %315 = vector.broadcast %cst_175 : f32 to vector<8x256xf32>
    %316 = arith.addf %315, %314 : vector<8x256xf32>
    %317 = arith.mulf %275, %316 : vector<8x256xf32>
    %c0_176 = arith.constant 0 : index
    %c0_177 = arith.constant 0 : index
    %318 = vector.load %arg15[%c0_176, %c0_177] : memref<256x64xf32, #tpu.memory_space<vmem>>, vector<256x64xf32>
    %cst_178 = arith.constant dense<0.000000e+00> : vector<8x64xf32>
    %319 = tpu.matmul %317, %318, %cst_178 {dimension_numbers = #tpu.dot_dimension_numbers<[1], [0], [0], [1], [0, 0, 1, 1], [], []>} : vector<8x256xf32>, vector<256x64xf32>, vector<8x64xf32> -> vector<8x64xf32>
    %320 = vector.extract_strided_slice %7 {offsets = [6, 0], sizes = [1, 64], strides = [1, 1]} : vector<8x64xf32> to vector<1x64xf32>
    %321 = vector.broadcast %320 : vector<1x64xf32> to vector<8x64xf32>
    %322 = arith.addf %319, %321 : vector<8x64xf32>
    %323 = arith.addf %268, %322 : vector<8x64xf32>
    %324 = vector.extract_strided_slice %7 {offsets = [4, 0], sizes = [1, 64], strides = [1, 1]} : vector<8x64xf32> to vector<1x64xf32>
    %325 = vector.extract_strided_slice %7 {offsets = [5, 0], sizes = [1, 64], strides = [1, 1]} : vector<8x64xf32> to vector<1x64xf32>
    %cst_179 = arith.constant dense<0.000000e+00> : vector<8xf32>
    %326 = vector.multi_reduction <add>, %323, %cst_179 [1] : vector<8x64xf32> to vector<8xf32>
    %327 = vector.shape_cast %326 : vector<8xf32> to vector<8x1xf32>
    %cst_180 = arith.constant 6.400000e+01 : f32
    %328 = vector.broadcast %cst_180 : f32 to vector<8x1xf32>
    %329 = arith.divf %327, %328 : vector<8x1xf32>
    %330 = vector.broadcast %329 : vector<8x1xf32> to vector<8x64xf32>
    %331 = arith.subf %323, %330 : vector<8x64xf32>
    %332 = arith.mulf %331, %331 : vector<8x64xf32>
    %cst_181 = arith.constant dense<0.000000e+00> : vector<8xf32>
    %333 = vector.multi_reduction <add>, %332, %cst_181 [1] : vector<8x64xf32> to vector<8xf32>
    %334 = vector.shape_cast %333 : vector<8xf32> to vector<8x1xf32>
    %cst_182 = arith.constant 6.400000e+01 : f32
    %335 = vector.broadcast %cst_182 : f32 to vector<8x1xf32>
    %336 = arith.divf %334, %335 : vector<8x1xf32>
    %cst_183 = arith.constant 9.99999974E-6 : f32
    %337 = vector.broadcast %cst_183 : f32 to vector<8x1xf32>
    %338 = arith.addf %336, %337 : vector<8x1xf32>
    %339 = math.rsqrt %338 : vector<8x1xf32>
    %340 = vector.broadcast %339 : vector<8x1xf32> to vector<8x64xf32>
    %341 = arith.mulf %331, %340 : vector<8x64xf32>
    %342 = vector.broadcast %324 : vector<1x64xf32> to vector<8x64xf32>
    %343 = arith.mulf %341, %342 : vector<8x64xf32>
    %344 = vector.broadcast %325 : vector<1x64xf32> to vector<8x64xf32>
    %345 = arith.addf %343, %344 : vector<8x64xf32>
    %c0_184 = arith.constant 0 : index
    %c0_185 = arith.constant 0 : index
    %c0_186 = arith.constant 0 : index
    %346 = vector.load %arg16[%c0_184, %c0_185, %c0_186] : memref<1x8x64xf32, #tpu.memory_space<vmem>>, vector<1x8x64xf32>
    %347 = vector.shape_cast %346 : vector<1x8x64xf32> to vector<8x64xf32>
    %348 = vector.shape_cast %345 : vector<8x64xf32> to vector<1x8x64xf32>
    tpu.vector_store %arg16[%c0_184, %c0_185, %c0_186], %348 {strides = array<i32>} : memref<1x8x64xf32, #tpu.memory_space<vmem>>, vector<1x8x64xf32>,
    return
  }
  func.func @transform_0(%arg0: i32, %arg1: i32) -> (i32, i32, i32) {
    %c0_i32 = arith.constant 0 : i32
    %c0_i32_0 = arith.constant 0 : i32
    return %arg0, %arg1, %c0_i32 : i32, i32, i32
  }
  func.func @transform_1(%arg0: i32, %arg1: i32) -> (i32, i32, i32) {
    %c0_i32 = arith.constant 0 : i32
    %c0_i32_0 = arith.constant 0 : i32
    %c0_i32_1 = arith.constant 0 : i32
    return %arg0, %c0_i32, %c0_i32_0 : i32, i32, i32
  }
  func.func @transform_2(%arg0: i32, %arg1: i32) -> (i32, i32, i32) {
    %c0_i32 = arith.constant 0 : i32
    %c0_i32_0 = arith.constant 0 : i32
    %c0_i32_1 = arith.constant 0 : i32
    return %arg0, %c0_i32, %c0_i32_0 : i32, i32, i32
  }
  func.func @transform_3(%arg0: i32, %arg1: i32) -> (i32, i32, i32) {
    %c0_i32 = arith.constant 0 : i32
    %c0_i32_0 = arith.constant 0 : i32
    %c0_i32_1 = arith.constant 0 : i32
    return %arg0, %c0_i32, %c0_i32_0 : i32, i32, i32
  }
  func.func @transform_4(%arg0: i32, %arg1: i32) -> (i32, i32, i32) {
    %c0_i32 = arith.constant 0 : i32
    %c0_i32_0 = arith.constant 0 : i32
    %c0_i32_1 = arith.constant 0 : i32
    %c0_i32_2 = arith.constant 0 : i32
    return %c0_i32, %c0_i32_0, %c0_i32_1 : i32, i32, i32
  }
  func.func @transform_5(%arg0: i32, %arg1: i32) -> (i32, i32) {
    %c0_i32 = arith.constant 0 : i32
    %c0_i32_0 = arith.constant 0 : i32
    %c0_i32_1 = arith.constant 0 : i32
    return %c0_i32, %c0_i32_0 : i32, i32
  }
  func.func @transform_6(%arg0: i32, %arg1: i32) -> (i32, i32, i32) {
    %c0_i32 = arith.constant 0 : i32
    %c0_i32_0 = arith.constant 0 : i32
    %c0_i32_1 = arith.constant 0 : i32
    %c0_i32_2 = arith.constant 0 : i32
    return %c0_i32, %c0_i32_0, %c0_i32_1 : i32, i32, i32
  }
  func.func @transform_7(%arg0: i32, %arg1: i32) -> (i32, i32) {
    %c0_i32 = arith.constant 0 : i32
    %c0_i32_0 = arith.constant 0 : i32
    %c0_i32_1 = arith.constant 0 : i32
    return %c0_i32, %c0_i32_0 : i32, i32
  }
  func.func @transform_8(%arg0: i32, %arg1: i32) -> (i32, i32, i32) {
    %c0_i32 = arith.constant 0 : i32
    %c0_i32_0 = arith.constant 0 : i32
    %c0_i32_1 = arith.constant 0 : i32
    %c0_i32_2 = arith.constant 0 : i32
    return %c0_i32, %c0_i32_0, %c0_i32_1 : i32, i32, i32
  }
  func.func @transform_9(%arg0: i32, %arg1: i32) -> (i32, i32, i32) {
    %c0_i32 = arith.constant 0 : i32
    %c0_i32_0 = arith.constant 0 : i32
    %c0_i32_1 = arith.constant 0 : i32
    %c0_i32_2 = arith.constant 0 : i32
    return %c0_i32, %c0_i32_0, %c0_i32_1 : i32, i32, i32
  }
  func.func @transform_10(%arg0: i32, %arg1: i32) -> (i32, i32) {
    %c0_i32 = arith.constant 0 : i32
    %c0_i32_0 = arith.constant 0 : i32
    %c0_i32_1 = arith.constant 0 : i32
    return %c0_i32, %c0_i32_0 : i32, i32
  }
  func.func @transform_11(%arg0: i32, %arg1: i32) -> (i32, i32) {
    %c0_i32 = arith.constant 0 : i32
    %c0_i32_0 = arith.constant 0 : i32
    %c0_i32_1 = arith.constant 0 : i32
    return %c0_i32, %c0_i32_0 : i32, i32
  }
  func.func @transform_12(%arg0: i32, %arg1: i32) -> (i32, i32) {
    %c0_i32 = arith.constant 0 : i32
    %c0_i32_0 = arith.constant 0 : i32
    %c0_i32_1 = arith.constant 0 : i32
    return %c0_i32, %c0_i32_0 : i32, i32
  }
  func.func @transform_13(%arg0: i32, %arg1: i32) -> (i32, i32) {
    %c0_i32 = arith.constant 0 : i32
    %c0_i32_0 = arith.constant 0 : i32
    %c0_i32_1 = arith.constant 0 : i32
    return %c0_i32, %c0_i32_0 : i32, i32
  }
  func.func @transform_14(%arg0: i32, %arg1: i32) -> (i32, i32, i32) {
    %c0_i32 = arith.constant 0 : i32
    %c0_i32_0 = arith.constant 0 : i32
    return %arg0, %arg1, %c0_i32 : i32, i32, i32
  }
}

</mosaic_0001>

<bundles_post_ra>
// kernel: tpu_custom_call.1
= control target key start
LH: loop header
LB: loop body
LE: loop exit
PB: predicated region body
PF: predicated region fallthrough
CT: control target
= control target key end

     0   :  { %19 = vsyncpa [#allocation6], 0  ;;  %s3626_s0 = inlined_call_operand.vmem [shape: f32[2,8,64], index: 0, kind: input, shape index: {}]   ;;  %s3627_s1 = inlined_call_operand.vmem [shape: f32[2,16,64], index: 1, kind: input, shape index: {}]   ;;  %s3628_s2 = inlined_call_operand.vmem [shape: f32[2,16,64], index: 2, kind: input, shape index: {}]   ;;  %s3629_s3 = inlined_call_operand.vmem [shape: f32[2,1,16], index: 3, kind: input, shape index: {}]   ;;  %s3630_s4 = inlined_call_operand.vmem [shape: f32[8,64,8], index: 4, kind: input, shape index: {}]   ;;  %s3631_s5 = inlined_call_operand.vmem [shape: f32[64,64], index: 5, kind: input, shape index: {}]   ;;  %s3632_s6 = inlined_call_operand.vmem [shape: f32[8,64,8], index: 6, kind: input, shape index: {}]   ;;  %s3633_s7 = inlined_call_operand.vmem [shape: f32[64,64], index: 7, kind: input, shape index: {}]   ;;  %s3634_s8 = inlined_call_operand.vmem [shape: f32[8,1,8], index: 8, kind: input, shape index: {}]   ;;  %s3635_s9 = inlined_call_operand.vmem [shape: f32[8,1,8], index: 9, kind: input, shape index: {}]   ;;  %s3636_s10 = inlined_call_operand.vmem [shape: f32[8,64], index: 10, kind: input, shape index: {}]   ;;  %s3637_s11 = inlined_call_operand.vmem [shape: f32[64,256], index: 11, kind: input, shape index: {}]   ;;  %s3638_s12 = inlined_call_operand.vmem [shape: f32[1,256], index: 12, kind: input, shape index: {}]   ;;  %s3639_s13 = inlined_call_operand.vmem [shape: f32[256,64], index: 13, kind: input, shape index: {}]   ;;  %s3640_s14 = inlined_call_operand.hbm [shape: f32[2,8,64], index: 14, kind: output, shape index: {}]  }
   0x1   :  { %21 = vsyncpa [#allocation6 + $0x1], 0  ;;  %s2685_s29 = smov 0   ;;  %s2687_s30 = smov 0  }
   0x2   :  { %s2689_s15 = smov 0   ;;  %s2691_s16 = smov 0  }
   0x3   :  { %s2693_s17 = smov 0   ;;  %s2695_s18 = smov 0  }
   0x4 LB: > { %3650 = sst [smem:[#allocation8_spill]] %s2579_s29  ;;  %s2203_s19 = sadd.s32 4294967295, %s2599_s18   ;;  %s2599_s18 = sphi %s2695_s18, %s27_s18   ;;  %s2595_s17 = sphi %s2693_s17, %s3670_s17   ;;  %s2591_s16 = sphi %s2691_s16, %s3666_s16   ;;  %s2587_s15 = sphi %s2689_s15, %s3665_s15   ;;  %s2583_s30 = sphi %s2687_s30, %s3669_s30   ;;  %s2579_s29 = sphi %s2685_s29, %s3668_s29  }
   0x5   : > { %3651 = sst [smem:[#allocation9_spill]] %s2587_s15  ;;  %s2204_s20 = sadd.s32 4294967294, %s2599_s18  }
   0x6   : > { %3652 = sst [smem:[#allocation10_spill]] %s2595_s17  ;;  %s39_s21 = sadd.s32 1, %s2595_s17 }
   0x7   : > { %3653 = sst [smem:[#allocation11_spill]] %s2599_s18  ;;  %s364_s22 = sadd.s32 1, %s2587_s15 }
   0x8   : > { %p41_p0 = scmp.ge.s32.totalorder %s39_s21, 2  ;;  %p374_p1 = scmp.ne.s32.totalorder %s2587_s15, %s2583_s30 }
   0x9   : > { %p375_p2 = scmp.eq.s32.totalorder %s2203_s19, 1  ;;  %p380_p3 = scmp.ne.s32.totalorder %s2583_s30, %s2579_s29 }
   0xa   : > { %s3672_s21 = smov (%p41_p0, %s39_s21), 0  ;;  %p381_p5 = scmp.eq.s32.totalorder %s2204_s20, 1 }
   0xb   : > { %3654 = sst [smem:[#allocation12_spill]] %s3672_s21  ;;  %p2725_p4 = por %p375_p2, %p374_p1 }
   0xc   : > { %s359_s24 = ssub.s32 %s2595_s17, %s3672_s21  ;;  %p2207_p6 = scmp.ge.s32.totalorder %s2599_s18, 1 }
   0xd   : > { %s3655_s23 = scalar_select %p2725_p4, 1, 0 }
   0xe   : > { %p362_p7 = scmp.eq.s32.totalorder %s359_s24, 0  ;;  %p2732_p8 = por %p381_p5, %p380_p3 }
   0xf   : > { %3656 = sst [smem:[#allocation13_spill]] %s3655_s23  ;;  %p461_p9 = scmp.lt.s32.totalorder %s2599_s18, 3 }
  0x10   : > { %s3657_s25 = scalar_select %p2732_p8, 1, 0 }
  0x11   : > { %s2738_s26 = scalar_select %p362_p7, %s2587_s15, %s364_s22  }
  0x12   : > { %3658 = sst [smem:[#allocation14_spill]] %s3657_s25  ;;  %p462_p10 = pnand %p2207_p6, %p461_p9 }
  0x13   : > { %3659 = sst [smem:[#allocation15_spill]] %s2738_s26  ;;  %p522_p11 = scmp.lt.s32.totalorder (!%p462_p10), %s2591_s16, 1 }
  0x14   : > { %465 = sbr.rel (%p462_p10) target bundleno = 2042 (0x7fa), region = 76  ;;  %s2603_s27 = smov (!%p462_p10), 24  }
  0x15   : > { %s2605_s28 = smov (!%p462_p10), 40   ;;  %s2606_s29 = smov (!%p462_p10), 48  }
  0x19   : > { %v557_v0 = vld [vmem:[%s3631_s5 + $0x38] sm:$0xff]  ;;  %v556_v1 = vld [vmem:[%s3631_s5 + $0x30] sm:$0xff]  ;;  %v555_v2 = vld [vmem:[%s3631_s5 + $0x28] sm:$0xff]  ;;  %s2751_s22 = scalar_select %p522_p11, %s2591_s16, 1  ;;  %vm560_vm0 = vcmask 523264   ;;  %vm672_vm1 = vcmask 64512  }
  0x1a   : > { %575 = vmatpush.msra.mxu1 %v557_v0  ;;  %v554_v3 = vld [vmem:[%s3631_s5 + $0x20] sm:$0xff]  ;;  %v553_v4 = vld [vmem:[%s3631_s5 + $0x18] sm:$0xff]  ;;  %v552_v5 = vld [vmem:[%s3631_s5 + $0x10] sm:$0xff]  ;;  %vm622_vm2 = vcmask 130048   ;;  %vm1165_vm3 = vcmask 130112   ;;  %vm1269_vm4 = vcmask 195712  }
  0x1b   : > { %s541_s15 = scalar_lea.vmem %s3629_s3, %s2751_s22  ;;  %s2389_s25 = sshll.u32 %s2751_s22, 4  ;;  %v551_v6 = vld [vmem:[%s3631_s5 + $0x8] sm:$0xff]  ;;  %v550_v7 = vld [vmem:[%s3631_s5] sm:$0xff]  ;;  %v638_v10 = vld [vmem:[%s3632_s6 + $0x38] sm:$0xff]  ;;  %vm1373_vm5 = vcmask 261312   ;;  %vm1477_vm6 = vcmask 326912  }
  0x1c   : > { %576 = vmatpush.msra.mxu1 %v556_v1  ;;  %s533_s26 = scalar_lea.vmem %s3627_s1, %s2389_s25  ;;  %v637_v11 = vld [vmem:[%s3632_s6 + $0x30] sm:$0xff]  ;;  %v636_v12 = vld [vmem:[%s3632_s6 + $0x28] sm:$0xff]  ;;  %v635_v13 = vld [vmem:[%s3632_s6 + $0x20] sm:$0xff]  ;;  %s2799_s20 = scalar_lea.vmem %s3628_s2, %s2389_s25  ;;  %vm1581_vm7 = vcmask 392512   ;;  %vm1685_vm8 = vcmask 458112   ;;  %vm1789_vm9 = vcmask 523712  }
  0x1d   : > { %v546_v8 = vld [vmem:[%s533_s26] sm:$0xff]  ;;  %v547_v9 = vld [vmem:[%s533_s26 + $0x8] sm:$0xff]  ;;  %v634_v14 = vld [vmem:[%s3632_s6 + $0x18] sm:$0xff]  ;;  %s2209_s17 = sshll.u32 %s2751_s22, 3  ;;  %s2602_s22 = smov 16  }
  0x1e   : > { %577 = vmatpush.msra.mxu1 %v555_v2  ;;  %v2247_v15 = vld [vmem:[%s3632_s6 + $0xf8] sm:$0xff]  ;;  %v633_v16 = vld [vmem:[%s3632_s6 + $0x10] sm:$0xff]  ;;  %v632_v19 = vld [vmem:[%s3632_s6 + $0x8] sm:$0xff]  ;;  %s2604_s26 = smov 32   ;;  %s2607_s25 = smov 56  }
  0x1f   : > { %777 = vmatpush.msra.mxu0 %v2247_v15  ;;  %v2236_v17 = vld [vmem:[%s3632_s6 + $0xb8] sm:$0xff]  ;;  %v2246_v18 = vld [vmem:[%s3632_s6 + $0xf0] sm:$0xff]  ;;  %v2245_v21 = vld [vmem:[%s3632_s6 + $0xe8] sm:$0xff] }
  0x20   : > { %578 = vmatpush.msra.mxu1 %v554_v3  ;;  %737 = vmatpush.msra.mxu3 %v2236_v17  ;;  %v2235_v20 = vld [vmem:[%s3632_s6 + $0xb0] sm:$0xff]  ;;  %v631_v22 = vld [vmem:[%s3632_s6] sm:$0xff]  ;;  %v2234_v23 = vld [vmem:[%s3632_s6 + $0xa8] sm:$0xff] }
  0x21   : > { %778 = vmatpush.msra.mxu0 %v2246_v18  ;;  %v2826_v24 = vld [vmem:[%s2799_s20] sm:$0xff]  ;;  %v2258_v27 = vld [vmem:[%s3632_s6 + $0x138] sm:$0xff]  ;;  %v2257_v30 = vld [vmem:[%s3632_s6 + $0x130] sm:$0xff] }
  0x22   : > { %579 = vmatpush.msra.mxu1 %v553_v4  ;;  %738 = vmatpush.msra.mxu3 %v2235_v20  ;;  %v2244_v25 = vld [vmem:[%s3632_s6 + $0xe0] sm:$0xff]  ;;  %v2243_v28 = vld [vmem:[%s3632_s6 + $0xd8] sm:$0xff]  ;;  %v2242_v31 = vld [vmem:[%s3632_s6 + $0xd0] sm:$0xff] }
  0x23   : > { %779 = vmatpush.msra.mxu0 %v2245_v21  ;;  %v2233_v26 = vld [vmem:[%s3632_s6 + $0xa0] sm:$0xff]  ;;  %v2232_v29 = vld [vmem:[%s3632_s6 + $0x98] sm:$0xff]  ;;  %v2231_v32 = vld [vmem:[%s3632_s6 + $0x90] sm:$0xff] }
  0x24   : > { %580 = vmatpush.msra.mxu1 %v552_v5  ;;  %739 = vmatpush.msra.mxu3 %v2234_v23  ;;  %v2256_v33 = vld [vmem:[%s3632_s6 + $0x128] sm:$0xff]  ;;  %v2255_v36 = vld [vmem:[%s3632_s6 + $0x120] sm:$0xff]  ;;  %v2254_v40 = vld [vmem:[%s3632_s6 + $0x118] sm:$0xff] }
  0x25   : > { %780 = vmatpush.msra.mxu0 %v2244_v25  ;;  %v2241_v34 = vld [vmem:[%s3632_s6 + $0xc8] sm:$0xff]  ;;  %v2240_v38 = vld [vmem:[%s3632_s6 + $0xc0] sm:$0xff]  ;;  %v2291_v41 = vld [vmem:[%s3632_s6 + $0x1f8] sm:$0xff] }
  0x26   : > { %581 = vmatpush.msra.mxu1 %v551_v6  ;;  %740 = vmatpush.msra.mxu3 %v2233_v26  ;;  %v2230_v35 = vld [vmem:[%s3632_s6 + $0x88] sm:$0xff]  ;;  %v2229_v39 = vld [vmem:[%s3632_s6 + $0x80] sm:$0xff]  ;;  %v2253_v42 = vld [vmem:[%s3632_s6 + $0x110] sm:$0xff] }
  0x27   : > { %781 = vmatpush.msra.mxu0 %v2243_v28  ;;  %v2867_v37 = vld [vmem:[%s2799_s20 + $0x8] sm:$0xff]  ;;  %v2280_v43 = vld [vmem:[%s3632_s6 + $0x1b8] sm:$0xff]  ;;  %v2290_v44 = vld [vmem:[%s3632_s6 + $0x1f0] sm:$0xff]  ;;  %s2985_s20 = scalar_lea.vmem %s3626_s0, %s2209_s17 }
  0x28   : > { %582 = vmatpush.msra.mxu1 %v550_v7  ;;  %741 = vmatpush.msra.mxu3 %v2232_v29  ;;  %v2252_v45 = vld [vmem:[%s3632_s6 + $0x108] sm:$0xff]  ;;  %v2279_v46 = vld [vmem:[%s3632_s6 + $0x1b0] sm:$0xff]  ;;  %v2457_v47 = vld [vmem:[%s3636_s10] ss:$0 sm:$0xff] }
  0x29   : > { %2214 = vmatmul.msk.f32.vlgmr.msra.gmra.mxu1 %vm560_vm0, %v546_v8  ;;  %782 = vmatpush.msra.mxu0 %v2242_v31  ;;  %v2289_v48 = vld [vmem:[%s3632_s6 + $0x1e8] sm:$0xff]  ;;  %v2251_v49 = vld [vmem:[%s3632_s6 + $0x100] sm:$0xff]  ;;  %v2287_v55 = vld [vmem:[%s3632_s6 + $0x1d8] sm:$0xff] }
  0x2a   : > { %657 = vmatpush.msrb.mxu1 %v638_v10  ;;  %742 = vmatpush.msra.mxu3 %v2231_v32  ;;  %v2278_v50 = vld [vmem:[%s3632_s6 + $0x1a8] sm:$0xff]  ;;  %v2288_v51 = vld [vmem:[%s3632_s6 + $0x1e0] sm:$0xff]  ;;  %v965_v56 = vld [vmem:[%s3630_s4 + $0x38] sm:$0xff] }
  0x2b   : > { %783 = vmatpush.msra.mxu0 %v2241_v34  ;;  %v2277_v54 = vld [vmem:[%s3632_s6 + $0x1a0] sm:$0xff]  ;;  %v2276_v57 = vld [vmem:[%s3632_s6 + $0x198] sm:$0xff]  ;;  %v2286_v58 = vld [vmem:[%s3632_s6 + $0x1d0] sm:$0xff] }
  0x2c   : > { %658 = vmatpush.msrb.mxu1 %v637_v11  ;;  %743 = vmatpush.msra.mxu3 %v2230_v35  ;;  %v964_v59 = vld [vmem:[%s3630_s4 + $0x30] sm:$0xff]  ;;  %v2285_v61 = vld [vmem:[%s3632_s6 + $0x1c8] sm:$0xff]  ;;  %v2284_v0 = vld [vmem:[%s3632_s6 + $0x1c0] sm:$0xff] }
  0x2d   : > { %784 = vmatpush.msra.mxu0 %v2240_v38  ;;  %v2275_v60 = vld [vmem:[%s3632_s6 + $0x190] sm:$0xff]  ;;  %v963_v62 = vld [vmem:[%s3630_s4 + $0x28] sm:$0xff]  ;;  %v962_v2 = vld [vmem:[%s3630_s4 + $0x20] sm:$0xff] }
  0x2e   : > { %659 = vmatpush.msrb.mxu1 %v636_v12  ;;  %2249 = vmatmul.msk.f32.vlgmr.msra.gmra.mxu0 %vm560_vm0, %v2826_v24  ;;  %v2274_v63 = vld [vmem:[%s3632_s6 + $0x188] sm:$0xff]  ;;  %v2273_v4 = vld [vmem:[%s3632_s6 + $0x180] sm:$0xff]  ;;  %v961_v5 = vld [vmem:[%s3630_s4 + $0x18] sm:$0xff] }
  0x2f   : > { %744 = vmatpush.msra.mxu3 %v2229_v39  ;;  %937 = vmatpush.msrb.mxu0 %v2291_v41  ;;  %v2305_v6 = vld [vmem:[%s3630_s4 + $0x78] sm:$0xff]  ;;  %v960_v7 = vld [vmem:[%s3630_s4 + $0x10] sm:$0xff]  ;;  %v959_v10 = vld [vmem:[%s3630_s4 + $0x8] sm:$0xff] }
  0x30   : > { %660 = vmatpush.msrb.mxu1 %v635_v13  ;;  %2238 = vmatmul.msk.f32.vlgmr.msra.gmra.mxu3 %vm560_vm0, %v2826_v24  ;;  %v2317_v8 = vld [vmem:[%s3630_s4 + $0xb8] sm:$0xff]  ;;  %v2316_v11 = vld [vmem:[%s3630_s4 + $0xb0] sm:$0xff]  ;;  %v2303_v12 = vld [vmem:[%s3630_s4 + $0x68] sm:$0xff] }
  0x31   : > { %2215 = vmatmul.msk.f32.gmra.mxu1 %vm560_vm0, %v547_v9  ;;  %897 = vmatpush.msrb.mxu3 %v2280_v43  ;;  %v2304_v9 = vld [vmem:[%s3630_s4 + $0x70] sm:$0xff]  ;;  %v958_v13 = vld [vmem:[%s3630_s4] sm:$0xff]  ;;  %v2301_v18 = vld [vmem:[%s3630_s4 + $0x58] sm:$0xff] }
  0x32   : > { %661 = vmatpush.msrb.mxu1 %v634_v14  ;;  %938 = vmatpush.msrb.mxu0 %v2290_v44  ;;  %v2315_v14 = vld [vmem:[%s3630_s4 + $0xa8] sm:$0xff]  ;;  %v3005_v15 = vld [vmem:[%s2985_s20] sm:$0xff]  ;;  %v2300_v20 = vld [vmem:[%s3630_s4 + $0x50] sm:$0xff] }
  0x33   : > { %898 = vmatpush.msrb.mxu3 %v2279_v46  ;;  %v2314_v17 = vld [vmem:[%s3630_s4 + $0xa0] sm:$0xff]  ;;  %v2312_v21 = vld [vmem:[%s3630_s4 + $0x90] sm:$0xff]  ;;  %v2311_v23 = vld [vmem:[%s3630_s4 + $0x88] sm:$0xff] }
  0x34   : > { %662 = vmatpush.msrb.mxu1 %v633_v16  ;;  %939 = vmatpush.msrb.mxu0 %v2289_v48  ;;  %v2302_v16 = vld [vmem:[%s3630_s4 + $0x60] sm:$0xff]  ;;  %v2341_v28 = vld [vmem:[%s3630_s4 + $0x138] sm:$0xff]  ;;  %v2328_v29 = vld [vmem:[%s3630_s4 + $0xf0] sm:$0xff] }
  0x35   : > { %899 = vmatpush.msrb.mxu3 %v2278_v50  ;;  %v2298_v25 = vld [vmem:[%s3630_s4 + $0x40] sm:$0xff]  ;;  %v2327_v31 = vld [vmem:[%s3630_s4 + $0xe8] sm:$0xff]  ;;  %v2325_v35 = vld [vmem:[%s3630_s4 + $0xd8] sm:$0xff] }
  0x36   : > { %663 = vmatpush.msrb.mxu1 %v632_v19  ;;  %940 = vmatpush.msrb.mxu0 %v2288_v51  ;;  %v2313_v19 = vld [vmem:[%s3630_s4 + $0x98] sm:$0xff]  ;;  %v2310_v26 = vld [vmem:[%s3630_s4 + $0x80] sm:$0xff]  ;;  %v2339_v32 = vld [vmem:[%s3630_s4 + $0x128] sm:$0xff] }
  0x37   : > { %2250 = vmatmul.msk.f32.gmra.mxu0 %vm560_vm0, %v2867_v37  ;;  %900 = vmatpush.msrb.mxu3 %v2277_v54  ;;  %v2338_v34 = vld [vmem:[%s3630_s4 + $0x120] sm:$0xff]  ;;  %v2324_v38 = vld [vmem:[%s3630_s4 + $0xd0] sm:$0xff]  ;;  %v2335_v41 = vld [vmem:[%s3630_s4 + $0x108] sm:$0xff] }
  0x38   : > { %664 = vmatpush.msrb.mxu1 %v631_v22  ;;  %941 = vmatpush.msrb.mxu0 %v2287_v55  ;;  %v2299_v22 = vld [vmem:[%s3630_s4 + $0x48] sm:$0xff]  ;;  %v2336_v39 = vld [vmem:[%s3630_s4 + $0x110] sm:$0xff]  ;;  %v2334_v43 = vld [vmem:[%s3630_s4 + $0x100] sm:$0xff] }
  0x39   : > { %2216 = vmatmul.msk.f32.vlgmr.msrb.gmra.mxu1 %vm560_vm0, %v2826_v24  ;;  %2239 = vmatmul.msk.f32.gmra.mxu3 %vm560_vm0, %v2867_v37  ;;  %v2353_v44 = vld [vmem:[%s3630_s4 + $0x178] sm:$0xff]  ;;  %v2352_v46 = vld [vmem:[%s3630_s4 + $0x170] sm:$0xff]  ;;  %v2351_v50 = vld [vmem:[%s3630_s4 + $0x168] sm:$0xff] }
  0x3a   : > { %817 = vmatpush.msra.mxu1 %v2258_v27  ;;  %901 = vmatpush.msrb.mxu3 %v2276_v57  ;;  %v2329_v27 = vld [vmem:[%s3630_s4 + $0xf8] sm:$0xff]  ;;  %v2364_v48 = vld [vmem:[%s3630_s4 + $0x1b0] sm:$0xff]  ;;  %v2363_v51 = vld [vmem:[%s3630_s4 + $0x1a8] sm:$0xff] }
  0x3b   : > { %942 = vmatpush.msrb.mxu0 %v2286_v58  ;;  %v2362_v54 = vld [vmem:[%s3630_s4 + $0x1a0] sm:$0xff]  ;;  %v2361_v57 = vld [vmem:[%s3630_s4 + $0x198] sm:$0xff] }
  0x3c   : > { %818 = vmatpush.msra.mxu1 %v2257_v30  ;;  %902 = vmatpush.msrb.mxu3 %v2275_v60  ;;  %v2340_v30 = vld [vmem:[%s3630_s4 + $0x130] sm:$0xff]  ;;  %v2222_v55 = vld [vmem:[%s3632_s6 + $0x60] sm:$0xff]  ;;  %v2221_v58 = vld [vmem:[%s3632_s6 + $0x58] sm:$0xff] }
  0x3d   : > { %943 = vmatpush.msrb.mxu0 %v2285_v61  ;;  %v2360_v60 = vld [vmem:[%s3630_s4 + $0x190] sm:$0xff] }
  0x3e   : > { %819 = vmatpush.msra.mxu1 %v2256_v33  ;;  %903 = vmatpush.msrb.mxu3 %v2274_v63  ;;  %v2326_v33 = vld [vmem:[%s3630_s4 + $0xe0] sm:$0xff]  ;;  %v2220_v61 = vld [vmem:[%s3632_s6 + $0x50] sm:$0xff]  ;;  %v2359_v63 = vld [vmem:[%s3630_s4 + $0x188] sm:$0xff] }
  0x3f   : > { %944 = vmatpush.msrb.mxu0 %v2284_v0  ;;  %v2346_v0 = vld [vmem:[%s3630_s4 + $0x140] sm:$0xff] }
  0x40   : > { %820 = vmatpush.msra.mxu1 %v2255_v36  ;;  %2293 = vmatmul.msk.f32.vlgmr.msrb.gmra.mxu0 %vm560_vm0, %v2826_v24  ;;  %v2337_v36 = vld [vmem:[%s3630_s4 + $0x118] sm:$0xff] }
  0x41   : > { %2217 = vmatmul.msk.f32.gmra.mxu1 %vm560_vm0, %v2867_v37  ;;  %904 = vmatpush.msrb.mxu3 %v2273_v4  ;;  %v2375_v4 = vld [vmem:[%s3630_s4 + $0x1e8] sm:$0xff] }
  0x42   : > { %821 = vmatpush.msra.mxu1 %v2254_v40  ;;  %1085 = vmatpush.msra.mxu0 %v2305_v6  ;;  %v2323_v40 = vld [vmem:[%s3630_s4 + $0xc8] sm:$0xff]  ;;  %v2373_v6 = vld [vmem:[%s3630_s4 + $0x1d8] sm:$0xff] }
  0x43   : > { %2282 = vmatmul.msk.f32.vlgmr.msrb.gmra.mxu3 %vm560_vm0, %v2826_v24 }
  0x44   : > { %822 = vmatpush.msra.mxu1 %v2253_v42  ;;  %1189 = vmatpush.msra.mxu3 %v2317_v8  ;;  %v2322_v42 = vld [vmem:[%s3630_s4 + $0xc0] sm:$0xff]  ;;  %v2371_v8 = vld [vmem:[%s3630_s4 + $0x1c8] sm:$0xff] }
  0x45   : > { %1086 = vmatpush.msra.mxu0 %v2304_v9  ;;  %v2370_v9 = vld [vmem:[%s3630_s4 + $0x1c0] sm:$0xff] }
  0x46   : > { %823 = vmatpush.msra.mxu1 %v2252_v45  ;;  %1190 = vmatpush.msra.mxu3 %v2316_v11  ;;  %v2365_v45 = vld [vmem:[%s3630_s4 + $0x1b8] sm:$0xff]  ;;  %v2218_v11 = vld [vmem:[%s3632_s6 + $0x40] sm:$0xff] }
  0x47   : > { %1087 = vmatpush.msra.mxu0 %v2303_v12  ;;  %v2269_v12 = vld [vmem:[%s3632_s6 + $0x178] sm:$0xff] }
  0x48   : > { %824 = vmatpush.msra.mxu1 %v2251_v49  ;;  %1191 = vmatpush.msra.mxu3 %v2315_v14  ;;  %v2224_v49 = vld [vmem:[%s3632_s6 + $0x70] sm:$0xff]  ;;  %v2267_v14 = vld [vmem:[%s3632_s6 + $0x168] sm:$0xff] }
  0x49   : > { %2260 = vmatmul.msk.f32.vlgmr.msra.gmra.mxu1 %vm560_vm0, %v2826_v24  ;;  %1088 = vmatpush.msra.mxu0 %v2302_v16  ;;  %v2265_v16 = vld [vmem:[%s3632_s6 + $0x158] sm:$0xff] }
  0x4a   : > { %982 = vmatpush.msrb.mxu1 %v965_v56  ;;  %2294 = vmatmul.msk.f32.gmra.mxu0 %vm560_vm0, %v2867_v37  ;;  %v2349_v56 = vld [vmem:[%s3630_s4 + $0x158] sm:$0xff] }
  0x4b   : > { %1192 = vmatpush.msra.mxu3 %v2314_v17  ;;  %1089 = vmatpush.msra.mxu0 %v2301_v18  ;;  %v2264_v17 = vld [vmem:[%s3632_s6 + $0x150] sm:$0xff]  ;;  %v2263_v18 = vld [vmem:[%s3632_s6 + $0x148] sm:$0xff] }
  0x4c   : > { %983 = vmatpush.msrb.mxu1 %v964_v59  ;;  %2283 = vmatmul.msk.f32.gmra.mxu3 %vm560_vm0, %v2867_v37  ;;  %v2348_v59 = vld [vmem:[%s3630_s4 + $0x150] sm:$0xff] }
  0x4d   : > { %1193 = vmatpush.msra.mxu3 %v2313_v19  ;;  %1090 = vmatpush.msra.mxu0 %v2300_v20  ;;  %v2262_v19 = vld [vmem:[%s3632_s6 + $0x140] sm:$0xff] }
  0x4e   : > { %984 = vmatpush.msrb.mxu1 %v963_v62  ;;  %v2347_v62 = vld [vmem:[%s3630_s4 + $0x148] sm:$0xff]  ;;  %v2458_v20 = vld [vmem:[%s3635_s9] ss:$0 sm:$0xff] }
  0x4f   : > { %1194 = vmatpush.msra.mxu3 %v2312_v21  ;;  %1091 = vmatpush.msra.mxu0 %v2299_v22 }
  0x50   : > { %985 = vmatpush.msrb.mxu1 %v962_v2  ;;  %v2377_v2 = vld [vmem:[%s3630_s4 + $0x1f8] sm:$0xff] }
  0x51   : > { %2261 = vmatmul.msk.f32.gmra.mxu1 %vm560_vm0, %v2867_v37  ;;  %1195 = vmatpush.msra.mxu3 %v2311_v23  ;;  %v2459_v23 = vld [vmem:[%s3635_s9 + $0x3] ss:$0 sm:$0xff] }
  0x52   : > { %986 = vmatpush.msrb.mxu1 %v961_v5  ;;  %1092 = vmatpush.msra.mxu0 %v2298_v25  ;;  %v2374_v5 = vld [vmem:[%s3630_s4 + $0x1e0] sm:$0xff] }
  0x53   : > { %2307 = vmatmul.msk.f32.vlgmr.msra.gmra.mxu0 %vm560_vm0, %v3005_v15  ;;  %1196 = vmatpush.msra.mxu3 %v2310_v26 }
  0x54   : > { %987 = vmatpush.msrb.mxu1 %v960_v7  ;;  %1293 = vmatpush.msrb.mxu0 %v2329_v27  ;;  %v2372_v7 = vld [vmem:[%s3630_s4 + $0x1d0] sm:$0xff] }
  0x55   : > { %2319 = vmatmul.msk.f32.vlgmr.msra.gmra.mxu3 %vm560_vm0, %v3005_v15 }
  0x56   : > { %988 = vmatpush.msrb.mxu1 %v959_v10  ;;  %1397 = vmatpush.msrb.mxu3 %v2341_v28  ;;  %v2219_v10 = vld [vmem:[%s3632_s6 + $0x48] sm:$0xff]  ;;  %v2460_v28 = vld [vmem:[%s3635_s9 + $0x2] ss:$0 sm:$0xff] }
  0x57   : > { %1294 = vmatpush.msrb.mxu0 %v2328_v29 }
  0x58   : > { %989 = vmatpush.msrb.mxu1 %v958_v13  ;;  %1398 = vmatpush.msrb.mxu3 %v2340_v30  ;;  %v2268_v13 = vld [vmem:[%s3632_s6 + $0x170] sm:$0xff] }
  0x59   : > { %2295 = vmatmul.msk.f32.vlgmr.msrb.gmra.mxu1 %vm560_vm0, %v3005_v15  ;;  %1295 = vmatpush.msrb.mxu0 %v2327_v31 }
  0x5a   : > { %1399 = vmatpush.msrb.mxu3 %v2339_v32 }
  0x5b   : > { %1296 = vmatpush.msrb.mxu0 %v2326_v33 }
  0x5c   : > { %1400 = vmatpush.msrb.mxu3 %v2338_v34 }
  0x5d   : > { %1297 = vmatpush.msrb.mxu0 %v2325_v35  ;;  %v2462_v35 = vld [vmem:[%s3635_s9 + $0x7] ss:$0 sm:$0xff] }
  0x5e   : > { %1401 = vmatpush.msrb.mxu3 %v2337_v36 }
  0x5f   : > { %1298 = vmatpush.msrb.mxu0 %v2324_v38 }
  0x60   : > { %1402 = vmatpush.msrb.mxu3 %v2336_v39 }
  0x61   : > { %1299 = vmatpush.msrb.mxu0 %v2323_v40 }
  0x62   : > { %1403 = vmatpush.msrb.mxu3 %v2335_v41 }
  0x63   : > { %1300 = vmatpush.msrb.mxu0 %v2322_v42 }
  0x64   : > { %2331 = vmatmul.msk.f32.vlgmr.msrb.gmra.mxu0 %vm560_vm0, %v3005_v15  ;;  %1404 = vmatpush.msrb.mxu3 %v2334_v43  ;;  %v2463_v43 = vld [vmem:[%s3635_s9 + $0x6] ss:$0 sm:$0xff] }
  0x65   : > { %1501 = vmatpush.msra.mxu0 %v2353_v44  ;;  %2343 = vmatmul.msk.f32.vlgmr.msrb.gmra.mxu3 %vm560_vm0, %v3005_v15 }
  0x66   : > { %1605 = vmatpush.msra.mxu3 %v2365_v45 }
  0x67   : > { %1502 = vmatpush.msra.mxu0 %v2352_v46 }
  0x68   : > { %1606 = vmatpush.msra.mxu3 %v2364_v48 }
  0x69   : > { %1503 = vmatpush.msra.mxu0 %v2351_v50 }
  0x6a   : > { %1607 = vmatpush.msra.mxu3 %v2363_v51  ;;  %v2464_v51 = vld [vmem:[%s3634_s8] ss:$0 sm:$0xff] }
  0x6c   : > { %1608 = vmatpush.msra.mxu3 %v2362_v54 }
  0x6e   : > { %1609 = vmatpush.msra.mxu3 %v2361_v57  ;;  %v2465_v57 = vld [vmem:[%s3634_s8 + $0x1] ss:$0 sm:$0xff] }
  0x70   : > { %1610 = vmatpush.msra.mxu3 %v2360_v60 }
  0x72   : > { %1611 = vmatpush.msra.mxu3 %v2359_v63  ;;  %v2466_v63 = vld [vmem:[%s3634_s8 + $0x2] ss:$0 sm:$0xff] }
  0xa6   : > { %v584_v52 = vpop.f32.mrf.mxu1 }
  0xa7   : > { %v585_v53 = vadd.f32 %v2457_v47, %v584_v52  ;;  %v2223_v52 = vld [vmem:[%s3632_s6 + $0x68] sm:$0xff] }
  0xa9   : > { %590 = vxpose.xlu0.b32.start [1/2] (short) (narrow) %v585_v53, 64  ;;  %v2350_v53 = vld [vmem:[%s3630_s4 + $0x160] sm:$0xff] }
  0xaa   : > { %1504 = vmatpush.msra.mxu0 %v2350_v53 }
  0xab   : > { %v786_v27 = vpop.f32.mrf.mxu0 }
  0xac   : > { %1505 = vmatpush.msra.mxu0 %v2349_v56 }
  0xae   : > { %v587_v1 = vpop.f32.mrf.mxu1  ;;  %1506 = vmatpush.msra.mxu0 %v2348_v59 }
  0xaf   : > { %v588_v3 = vadd.f32 %v2457_v47, %v587_v1  ;;  %v2225_v47 = vld [vmem:[%s3632_s6 + $0x78] sm:$0xff]  ;;  %v2358_v1 = vld [vmem:[%s3630_s4 + $0x180] sm:$0xff] }
  0xb0   : > { %697 = vmatpush.msra.mxu2 %v2225_v47  ;;  %1507 = vmatpush.msra.mxu0 %v2347_v62 }
  0xb1   : > { %591 = vxpose.xlu0.b32.end [2/2] (short) (narrow) %v588_v3, 64  ;;  %1612 = vmatpush.msra.mxu3 %v2358_v1  ;;  %v2376_v3 = vld [vmem:[%s3630_s4 + $0x1f0] sm:$0xff] }
  0xb2   : > { %698 = vmatpush.msra.mxu2 %v2224_v49  ;;  %1508 = vmatpush.msra.mxu0 %v2346_v0 }
  0xb3   : > { %2355 = vmatmul.msk.f32.vlgmr.msra.gmra.mxu0 %vm560_vm0, %v3005_v15  ;;  %2367 = vmatmul.msk.f32.vlgmr.msra.gmra.mxu3 %vm560_vm0, %v3005_v15  ;;  %v746_v29 = vpop.f32.mrf.mxu3 }
  0xb4   : > { %699 = vmatpush.msra.mxu2 %v2223_v52  ;;  %1709 = vmatpush.msrb.mxu0 %v2377_v2  ;;  %v747_v31 = vadd.f32 %v2460_v28, %v746_v29  ;;  %v789_v32 = vpop.f32.mrf.mxu0 }
  0xb5   : > { %v790_v34 = vadd.f32 %v2459_v23, %v789_v32  ;;  %v2473_v32 = vld [vmem:[%s3635_s9 + $0x5] ss:$0 sm:$0xff] }
  0xb6   : > { %700 = vmatpush.msra.mxu2 %v2222_v55  ;;  %1710 = vmatpush.msrb.mxu0 %v2376_v3  ;;  %v666_v21 = vpop.f32.mrf.mxu1  ;;  %753 = vst.msk [vmem:[#allocation3 + $0x20] sm:$0xff] %vm672_vm1, %v747_v31 }
  0xb7   : > { %v667_v22 = vadd.f32 %v2458_v20, %v666_v21  ;;  %794 = vst.msk [vmem:[#allocation3 + $0x38] sm:$0xff] %vm672_vm1, %v790_v34  ;;  %v2470_v21 = vld [vmem:[%s3634_s8 + $0x6] ss:$0 sm:$0xff] }
  0xb8   : > { %701 = vmatpush.msra.mxu2 %v2221_v58  ;;  %1711 = vmatpush.msrb.mxu0 %v2375_v4  ;;  %v2467_v4 = vld [vmem:[%s3634_s8 + $0x3] ss:$0 sm:$0xff] }
  0xb9   : > { %673 = vst.msk [vmem:[#allocation3] sm:$0xff] %vm672_vm1, %v667_v22 }
  0xba   : > { %702 = vmatpush.msra.mxu2 %v2220_v61  ;;  %1712 = vmatpush.msrb.mxu0 %v2374_v5 }
  0xbc   : > { %1713 = vmatpush.msrb.mxu0 %v2373_v6  ;;  %703 = vmatpush.msra.mxu2 %v2219_v10  ;;  %v749_v36 = vpop.f32.mrf.mxu3 }
  0xbd   : > { %v750_v38 = vadd.f32 %v2460_v28, %v749_v36  ;;  %v946_v40 = vpop.f32.mrf.mxu0 }
  0xbe   : > { %1714 = vmatpush.msrb.mxu0 %v2372_v7  ;;  %704 = vmatpush.msra.mxu2 %v2218_v11  ;;  %v669_v25 = vpop.f32.mrf.mxu1  ;;  %v947_v42 = vadd.f32 %v2462_v35, %v946_v40  ;;  %v2456_v40 = vld [vmem:[%s541_s15] ss:$0 sm:$0xff]  ;;  %s2601_s15 = smov 8  }
  0xbf   : > { %2227 = vmatmul.msk.f32.vlgmr.msra.gmra.mxu2 %vm560_vm0, %v2826_v24  ;;  %v670_v26 = vadd.f32 %v2458_v20, %v669_v25  ;;  %754 = vst.msk [vmem:[#allocation3 + $0x28] sm:$0xff] %vm672_vm1, %v750_v38 }
  0xc0   : > { %1715 = vmatpush.msrb.mxu0 %v2371_v8  ;;  %857 = vmatpush.msrb.mxu2 %v2269_v12  ;;  %953 = vst.msk [vmem:[#allocation3 + $0x70] sm:$0xff] %vm672_vm1, %v947_v42  ;;  %v1037_v59 = vld [vmem:[#allocation3] sm:$0xff] }
  0xc1   : > { %674 = vst.msk [vmem:[#allocation3 + $0x8] sm:$0xff] %vm672_vm1, %v670_v26 }
  0xc2   : > { %1716 = vmatpush.msrb.mxu0 %v2370_v9  ;;  %858 = vmatpush.msrb.mxu2 %v2268_v13  ;;  %v2468_v9 = vld [vmem:[%s3634_s8 + $0x4] ss:$0 sm:$0xff] }
  0xc3   : > { %2379 = vmatmul.msk.f32.vlgmr.msrb.gmra.mxu0 %vm560_vm0, %v3005_v15  ;;  %v2266_v15 = vld [vmem:[%s3632_s6 + $0x160] sm:$0xff] }
  0xc4   : > { %859 = vmatpush.msrb.mxu2 %v2267_v14  ;;  %v2469_v14 = vld [vmem:[%s3634_s8 + $0x5] ss:$0 sm:$0xff] }
  0xc6   : > { %860 = vmatpush.msrb.mxu2 %v2266_v15  ;;  %v826_v30 = vpop.f32.mrf.mxu1  ;;  %v906_v44 = vpop.f32.mrf.mxu3 }
  0xc7   : > { %2228 = vmatmul.msk.f32.gmra.mxu2 %vm560_vm0, %v2867_v37  ;;  %v907_v45 = vadd.f32 %v2463_v43, %v906_v44  ;;  %v949_v46 = vpop.f32.mrf.mxu0 }
  0xc8   : > { %861 = vmatpush.msrb.mxu2 %v2265_v16  ;;  %v950_v47 = vadd.f32 %v2462_v35, %v949_v46  ;;  %v1038_v56 = vld [vmem:[#allocation3 + $0x8] sm:$0xff] }
  0xc9   : > { %913 = vst.msk [vmem:[#allocation3 + $0x60] sm:$0xff] %vm672_vm1, %v907_v45 }
  0xca   : > { %862 = vmatpush.msrb.mxu2 %v2264_v17  ;;  %954 = vst.msk [vmem:[#allocation3 + $0x78] sm:$0xff] %vm672_vm1, %v950_v47 }
  0xcc   : > { %863 = vmatpush.msrb.mxu2 %v2263_v18 }
  0xce   : > { %864 = vmatpush.msrb.mxu2 %v2262_v19  ;;  %v829_v39 = vpop.f32.mrf.mxu1  ;;  %v2472_v19 = vld [vmem:[%s3635_s9 + $0x1] ss:$0 sm:$0xff] }
  0xcf   : > { %2271 = vmatmul.msk.f32.vlgmr.msrb.gmra.mxu2 %vm560_vm0, %v2826_v24  ;;  %v787_v24 = vadd.f32 %v2459_v23, %v786_v27  ;;  %v909_v48 = vpop.f32.mrf.mxu3 }
  0xd0   : > { %v910_v49 = vadd.f32 %v2463_v43, %v909_v48  ;;  %v1094_v58 = vpop.f32.mrf.mxu0 }
  0xd1   : > { %793 = vst.msk [vmem:[#allocation3 + $0x30] sm:$0xff] %vm672_vm1, %v787_v24  ;;  %v1095_v60 = vadd.f32 %v2465_v57, %v1094_v58  ;;  %v2471_v24 = vld [vmem:[%s3634_s8 + $0x7] ss:$0 sm:$0xff] }
  0xd2   : > { %914 = vst.msk [vmem:[#allocation3 + $0x68] sm:$0xff] %vm672_vm1, %v910_v49 }
  0xd6   : > { %v991_v52 = vpop.f32.mrf.mxu1 }
  0xd7   : > { %2272 = vmatmul.msk.f32.gmra.mxu2 %vm560_vm0, %v2867_v37  ;;  %v2461_v37 = vld [vmem:[%s3635_s9 + $0x4] ss:$0 sm:$0xff]  ;;  %v992_v53 = vadd.f32 %v2464_v51, %v991_v52 }
  0xd8   : > { %v827_v33 = vadd.f32 %v2461_v37, %v826_v30  ;;  %v830_v41 = vadd.f32 %v2461_v37, %v829_v39  ;;  %v1198_v0 = vpop.f32.mrf.mxu3 }
  0xd9   : > { %v1199_v1 = vadd.f32 %v2466_v63, %v1198_v0 }
  0xda   : > { %833 = vst.msk [vmem:[#allocation3 + $0x40] sm:$0xff] %vm672_vm1, %v827_v33 }
  0xdb   : > { %834 = vst.msk [vmem:[#allocation3 + $0x48] sm:$0xff] %vm672_vm1, %v830_v41 }
  0xe1   : > { %v1302_v5 = vpop.f32.mrf.mxu0 }
  0xe2   : > { %v1303_v6 = vadd.f32 %v2467_v4, %v1302_v5 }
  0xe8   : > { %v1406_v10 = vpop.f32.mrf.mxu3 }
  0xe9   : > { %v1407_v11 = vadd.f32 %v2468_v9, %v1406_v10 }
 0x130   : > { %v1510_v15 = vpop.f32.mrf.mxu0 }
 0x131   : > { %v1511_v16 = vadd.f32 %v2469_v14, %v1510_v15 }
 0x136   : > { %v1614_v23 = vpop.f32.mrf.mxu3 }
 0x137   : > { %v1615_v25 = vadd.f32 %v2470_v21, %v1614_v23 }
 0x140   : > { %v1718_v37 = vpop.f32.mrf.mxu0 }
 0x141   : > { %v1719_v30 = vadd.f32 %v2471_v24, %v1718_v37 }
 0x142   : > { %v706_v20 = vpop.f32.mrf.mxu2 }
 0x143   : > { %v707_v22 = vadd.f32 %v2472_v19, %v706_v20 }
 0x145   : > { %713 = vst.msk [vmem:[#allocation3 + $0x10] sm:$0xff] %vm672_vm1, %v707_v22 }
 0x14a   : > { %v709_v28 = vpop.f32.mrf.mxu2 }
 0x14b   : > { %v710_v29 = vadd.f32 %v2472_v19, %v709_v28 }
 0x14c   : > { %v1136_v35 = vld [vmem:[#allocation3 + $0x10] sm:$0xff] }
 0x14d   : > { %v606_v50 = vpop.trf.xlu0  ;;  %714 = vst.msk [vmem:[#allocation3 + $0x18] sm:$0xff] %vm672_vm1, %v710_v29 }
 0x14e   : > { %623 = vst.msk [vmem:[#allocation2] sm:$0xff] %vm622_vm2, %v606_v50 }
 0x152   : > { %v866_v33 = vpop.f32.mrf.mxu2 }
 0x153   : > { %v867_v36 = vadd.f32 %v2473_v32, %v866_v33 }
 0x154   : > { %v1137_v34 = vld [vmem:[#allocation3 + $0x18] sm:$0xff] }
 0x155   : > { %v607_v54 = vpop.trf.xlu0  ;;  %v994_v55 = vld [vmem:[#allocation2] sm:$0xff]  ;;  %873 = vst.msk [vmem:[#allocation3 + $0x50] sm:$0xff] %vm672_vm1, %v867_v36 }
 0x156   : > { %624 = vst.msk [vmem:[#allocation2 + $0x8] sm:$0xff] %vm622_vm2, %v607_v54  ;;  %1017 = vmatpush.msra.mxu2 %v994_v55 }
 0x157   : > { %2296 = vmatmul.msk.f32.vlgmr.msra.gmra.mxu2 %vm672_vm1, %v992_v53 }
 0x158   : > { %1056 = vmatpush.msrb.mxu2 %v1038_v56 }
 0x15a   : > { %1057 = vmatpush.msrb.mxu2 %v1037_v59  ;;  %v869_v38 = vpop.f32.mrf.mxu2 }
 0x15b   : > { %v870_v39 = vadd.f32 %v2473_v32, %v869_v38 }
 0x15c   : > { %1155 = vmatpush.msra.mxu2 %v1137_v34 }
 0x15d   : > { %v608_v61 = vpop.trf.xlu0  ;;  %v1097_v62 = vld [vmem:[#allocation2 + $0x8] sm:$0xff]  ;;  %874 = vst.msk [vmem:[#allocation3 + $0x58] sm:$0xff] %vm672_vm1, %v870_v39 }
 0x15e   : > { %625 = vst.msk [vmem:[#allocation2 + $0x10] sm:$0xff] %vm622_vm2, %v608_v61  ;;  %1116 = vmatpush.msra.mxu1 %v1097_v62  ;;  %1156 = vmatpush.msra.mxu2 %v1136_v35 }
 0x15f   : > { %2308 = vmatmul.msk.f32.vlgmr.msra.gmra.mxu1 %vm672_vm1, %v1095_v60 }
 0x165   : > { %v609_v2 = vpop.trf.xlu0  ;;  %v1201_v3 = vld [vmem:[#allocation2 + $0x10] sm:$0xff] }
 0x166   : > { %626 = vst.msk [vmem:[#allocation2 + $0x18] sm:$0xff] %vm622_vm2, %v609_v2  ;;  %1220 = vmatpush.msrb.mxu1 %v1201_v3 }
 0x167   : > { %2320 = vmatmul.msk.f32.vlgmr.msrb.gmra.mxu1 %vm672_vm1, %v1199_v1 }
 0x16d   : > { %v610_v7 = vpop.trf.xlu0  ;;  %v1305_v8 = vld [vmem:[#allocation2 + $0x18] sm:$0xff] }
 0x16e   : > { %627 = vst.msk [vmem:[#allocation2 + $0x20] sm:$0xff] %vm622_vm2, %v610_v7  ;;  %1324 = vmatpush.msra.mxu1 %v1305_v8 }
 0x16f   : > { %2332 = vmatmul.msk.f32.vlgmr.msra.gmra.mxu1 %vm672_vm1, %v1303_v6 }
 0x175   : > { %v611_v12 = vpop.trf.xlu0  ;;  %v1409_v13 = vld [vmem:[#allocation2 + $0x20] sm:$0xff] }
 0x176   : > { %628 = vst.msk [vmem:[#allocation2 + $0x28] sm:$0xff] %vm622_vm2, %v611_v12  ;;  %1428 = vmatpush.msrb.mxu1 %v1409_v13 }
 0x177   : > { %2344 = vmatmul.msk.f32.vlgmr.msrb.gmra.mxu1 %vm672_vm1, %v1407_v11 }
 0x17d   : > { %v612_v17 = vpop.trf.xlu0  ;;  %v1513_v18 = vld [vmem:[#allocation2 + $0x28] sm:$0xff] }
 0x17e   : > { %629 = vst.msk [vmem:[#allocation2 + $0x30] sm:$0xff] %vm622_vm2, %v612_v17  ;;  %1532 = vmatpush.msra.mxu1 %v1513_v18 }
 0x17f   : > { %2356 = vmatmul.msk.f32.vlgmr.msra.gmra.mxu1 %vm672_vm1, %v1511_v16 }
 0x185   : > { %v613_v26 = vpop.trf.xlu0  ;;  %v1617_v27 = vld [vmem:[#allocation2 + $0x30] sm:$0xff] }
 0x186   : > { %630 = vst.msk [vmem:[#allocation2 + $0x38] sm:$0xff] %vm622_vm2, %v613_v26  ;;  %1636 = vmatpush.msrb.mxu1 %v1617_v27 }
 0x187   : > { %2368 = vmatmul.msk.f32.vlgmr.msrb.gmra.mxu1 %vm672_vm1, %v1615_v25 }
 0x18d   : > { %v1721_v31 = vld [vmem:[#allocation2 + $0x38] sm:$0xff] }
 0x18e   : > { %1740 = vmatpush.msra.mxu1 %v1721_v31 }
 0x18f   : > { %2380 = vmatmul.msk.f32.vlgmr.msra.gmra.mxu1 %vm672_vm1, %v1719_v30 }
 0x1da   : > { %v1019_v41 = vpop.f32.mrf.mxu2 }
 0x1db   : > { %v1020_v42 = vadd.f32 %v2456_v40, %v1019_v41 }
 0x1dc   : > { %v1118_v43 = vpop.f32.mrf.mxu1 }
 0x1dd   : > { %v1023_v44 = vsel %vm622_vm2, %v1020_v42, -inf  ;;  %v1119_v45 = vadd.f32 %v2456_v40, %v1118_v43 }
 0x1de   : > { %1024 = vmax.xlane.f32.xlu1 %v1023_v44 }
 0x1df   : > { %v1121_v46 = vsel %vm622_vm2, %v1119_v45, -inf }
 0x1e4   : > { %v1222_v47 = vpop.f32.mrf.mxu1 }
 0x1e5   : > { %v1223_v48 = vadd.f32 %v2456_v40, %v1222_v47 }
 0x1e6   : > { %1122 = vmax.xlane.f32.xlu1 %v1121_v46 }
 0x1e7   : > { %v1225_v49 = vsel %vm622_vm2, %v1223_v48, -inf }
 0x1e8   : > { %1226 = vmax.xlane.f32.xlu2 %v1225_v49 }
 0x1ec   : > { %v1326_v50 = vpop.f32.mrf.mxu1 }
 0x1ed   : > { %v1327_v51 = vadd.f32 %v2456_v40, %v1326_v50 }
 0x1ef   : > { %v1329_v52 = vsel %vm622_vm2, %v1327_v51, -inf }
 0x1f0   : > { %1330 = vmax.xlane.f32.xlu2 %v1329_v52 }
 0x1f4   : > { %v1430_v53 = vpop.f32.mrf.mxu1 }
 0x1f5   : > { %v1431_v54 = vadd.f32 %v2456_v40, %v1430_v53 }
 0x1f7   : > { %v1433_v55 = vsel %vm622_vm2, %v1431_v54, -inf }
 0x1f8   : > { %1434 = vmax.xlane.f32.xlu0 %v1433_v55  ;;  %v1240_v55 = vld [vmem:[#allocation3 + $0x20] sm:$0xff] }
 0x1fc   : > { %v1534_v56 = vpop.f32.mrf.mxu1 }
 0x1fd   : > { %v1535_v57 = vadd.f32 %v2456_v40, %v1534_v56 }
 0x1ff   : > { %v1537_v58 = vsel %vm622_vm2, %v1535_v57, -inf }
 0x200   : > { %1538 = vmax.xlane.f32.xlu1 %v1537_v58 }
 0x204   : > { %v1638_v59 = vpop.f32.mrf.mxu1 }
 0x205   : > { %v1639_v60 = vadd.f32 %v2456_v40, %v1638_v59 }
 0x207   : > { %v1641_v61 = vsel %vm622_vm2, %v1639_v60, -inf }
 0x208   : > { %1642 = vmax.xlane.f32.xlu2 %v1641_v61 }
 0x20c   : > { %v1742_v62 = vpop.f32.mrf.mxu1 }
 0x20d   : > { %v1743_v63 = vadd.f32 %v2456_v40, %v1742_v62 }
 0x20f   : > { %v1745_v0 = vsel %vm622_vm2, %v1743_v63, -inf }
 0x210   : > { %1746 = vmax.xlane.f32.xlu2 %v1745_v0 }
 0x251   : > { %v1025_v1 = vpop.xlane.xlu1 %1024 }
 0x252   : > { %v1026_v2 = vsub.f32 %v1020_v42, %v1025_v1  ;;  %v1344_v1 = vld [vmem:[#allocation3 + $0x30] sm:$0xff] }
 0x254   : > { %v1027_v3 = vmul.f32 1.442695, %v1026_v2 }
 0x256   : > { %2474 = vpow2.f32 %v1027_v3 }
 0x259   : > { %v1123_v4 = vpop.xlane.xlu1 %1122 }
 0x25a   : > { %v1124_v5 = vsub.f32 %v1119_v45, %v1123_v4  ;;  %v1449_v4 = vld [vmem:[#allocation3 + $0x48] sm:$0xff] }
 0x25b   : > { %v1227_v6 = vpop.xlane.xlu2 %1226 }
 0x25c   : > { %v2475_v7 = vpop.eup %2474  ;;  %v1125_v8 = vmul.f32 1.442695, %v1124_v5  ;;  %v1228_v9 = vsub.f32 %v1223_v48, %v1227_v6 }
 0x25d   : > { %v1029_v10 = vsel %vm622_vm2, %v2475_v7, 0.0 }
 0x25e   : > { %2476 = vpow2.f32 %v1125_v8  ;;  %v1229_v11 = vmul.f32 1.442695, %v1228_v9  ;;  %1030 = vadd.xlane.f32.xlu1 %v1029_v10  ;;  %v1448_v8 = vld [vmem:[#allocation3 + $0x40] sm:$0xff] }
 0x260   : > { %2478 = vpow2.f32 %v1229_v11 }
 0x263   : > { %v1331_v12 = vpop.xlane.xlu2 %1330 }
 0x264   : > { %v3327_v13 = vpop.eup %2476  ;;  %v1332_v14 = vsub.f32 %v1327_v51, %v1331_v12  ;;  %v1241_v51 = vld [vmem:[#allocation3 + $0x28] sm:$0xff]  ;;  %v1553_v12 = vld [vmem:[#allocation3 + $0x58] sm:$0xff] }
 0x265   : > { %v1127_v15 = vsel %vm622_vm2, %v3327_v13, 0.0 }
 0x266   : > { %v3331_v16 = vpop.eup %2478  ;;  %v1333_v17 = vmul.f32 1.442695, %v1332_v14  ;;  %1128 = vadd.xlane.f32.xlu1 %v1127_v15 }
 0x267   : > { %v1231_v18 = vsel %vm622_vm2, %v3331_v16, 0.0 }
 0x268   : > { %2480 = vpow2.f32 %v1333_v17  ;;  %1232 = vadd.xlane.f32.xlu2 %v1231_v18  ;;  %v1552_v17 = vld [vmem:[#allocation3 + $0x50] sm:$0xff] }
 0x26b   : > { %v1435_v19 = vpop.xlane.xlu0 %1434 }
 0x26c   : > { %v1436_v20 = vsub.f32 %v1431_v54, %v1435_v19 }
 0x26e   : > { %v3335_v21 = vpop.eup %2480  ;;  %v1437_v22 = vmul.f32 1.442695, %v1436_v20  ;;  %v1657_v20 = vld [vmem:[#allocation3 + $0x68] sm:$0xff] }
 0x26f   : > { %v1335_v23 = vsel %vm622_vm2, %v3335_v21, 0.0 }
 0x270   : > { %2482 = vpow2.f32 %v1437_v22  ;;  %1336 = vadd.xlane.f32.xlu1 %v1335_v23 }
 0x273   : > { %v1539_v25 = vpop.xlane.xlu1 %1538 }
 0x274   : > { %v1540_v26 = vsub.f32 %v1535_v57, %v1539_v25  ;;  %v1656_v25 = vld [vmem:[#allocation3 + $0x60] sm:$0xff] }
 0x276   : > { %v3339_v27 = vpop.eup %2482  ;;  %v1541_v24 = vmul.f32 1.442695, %v1540_v26 }
 0x277   : > { %v1439_v28 = vsel %vm622_vm2, %v3339_v27, 0.0 }
 0x278   : > { %2484 = vpow2.f32 %v1541_v24  ;;  %1440 = vadd.xlane.f32.xlu2 %v1439_v28 }
 0x27b   : > { %v1643_v37 = vpop.xlane.xlu2 %1642 }
 0x27c   : > { %v1644_v29 = vsub.f32 %v1639_v60, %v1643_v37  ;;  %v1345_v60 = vld [vmem:[#allocation3 + $0x38] sm:$0xff] }
 0x27d   : > { %v1761_v37 = vld [vmem:[#allocation3 + $0x78] sm:$0xff] }
 0x27e   : > { %v3343_v30 = vpop.eup %2484  ;;  %v1645_v31 = vmul.f32 1.442695, %v1644_v29 }
 0x27f   : > { %v1543_v32 = vsel %vm622_vm2, %v3343_v30, 0.0 }
 0x280   : > { %2486 = vpow2.f32 %v1645_v31  ;;  %1544 = vadd.xlane.f32.xlu1 %v1543_v32  ;;  %v1760_v32 = vld [vmem:[#allocation3 + $0x70] sm:$0xff] }
 0x283   : > { %v1747_v33 = vpop.xlane.xlu2 %1746 }
 0x284   : > { %v1748_v34 = vsub.f32 %v1743_v63, %v1747_v33 }
 0x286   : > { %v3347_v35 = vpop.eup %2486  ;;  %v1749_v36 = vmul.f32 1.442695, %v1748_v34 }
 0x287   : > { %v1647_v38 = vsel %vm622_vm2, %v3347_v35, 0.0 }
 0x288   : > { %2488 = vpow2.f32 %v1749_v36  ;;  %1648 = vadd.xlane.f32.xlu2 %v1647_v38 }
 0x28e   : > { %v3351_v39 = vpop.eup %2488 }
 0x28f   : > { %v1751_v40 = vsel %vm622_vm2, %v3351_v39, 0.0 }
 0x290   : > { %1752 = vadd.xlane.f32.xlu1 %v1751_v40 }
 0x2d1   : > { %v1031_v41 = vpop.xlane.xlu1 %1030 }
 0x2d2   : > { %2490 = vrcp.f32 %v1031_v41 }
 0x2d8   : > { %v2491_v42 = vpop.eup %2490 }
 0x2d9   : > { %v1033_v43 = vmul.f32 %v2491_v42, %v1031_v41  ;;  %v1129_v44 = vpop.xlane.xlu1 %1128 }
 0x2da   : > { %2492 = vrcp.f32 %v1129_v44 }
 0x2db   : > { %v1034_v45 = vsub.f32 2.0, %v1033_v43  ;;  %v1233_v46 = vpop.xlane.xlu2 %1232 }
 0x2dc   : > { %2494 = vrcp.f32 %v1233_v46 }
 0x2dd   : > { %v1035_v47 = vmul.f32 %v2491_v42, %v1034_v45 }
 0x2df   : > { %v1036_v48 = vmul.f32 %v2475_v7, %v1035_v47  ;;  %v1799_v47 = vld [vmem:[%s3633_s7 + $0x38] sm:$0xff] }
 0x2e0   : > { %v2493_v49 = vpop.eup %2492  ;;  %1812 = vmatpush.msrb.mxu3 %v1799_v47  ;;  %v1996_v47 = vld [vmem:[%s3639_s13 + $0x78] sm:$0xff] }
 0x2e1   : > { %v1131_v50 = vmul.f32 %v2493_v49, %v1129_v44  ;;  %2297 = vmatmul.msk.f32.vlgmr.msrb.gmra.mxu2 %vm622_vm2, %v1036_v48  ;;  %v1798_v48 = vld [vmem:[%s3633_s7 + $0x30] sm:$0xff]  ;;  %2014 = vmatpush.msra.mxu0 %v1996_v47 }
 0x2e2   : > { %v2495_v52 = vpop.eup %2494  ;;  %1259 = vmatpush.msrb.mxu2 %v1241_v51  ;;  %1813 = vmatpush.msrb.mxu3 %v1798_v48  ;;  %v1995_v48 = vld [vmem:[%s3639_s13 + $0x70] sm:$0xff] }
 0x2e3   : > { %v1132_v53 = vsub.f32 2.0, %v1131_v50  ;;  %v1235_v54 = vmul.f32 %v2495_v52, %v1233_v46  ;;  %v1337_v56 = vpop.xlane.xlu1 %1336  ;;  %v1796_v50 = vld [vmem:[%s3633_s7 + $0x20] sm:$0xff]  ;;  %2015 = vmatpush.msra.mxu0 %v1995_v48 }
 0x2e4   : > { %1260 = vmatpush.msrb.mxu2 %v1240_v55  ;;  %2496 = vrcp.f32 %v1337_v56  ;;  %v1793_v55 = vld [vmem:[%s3633_s7 + $0x8] sm:$0xff] }
 0x2e5   : > { %v1133_v57 = vmul.f32 %v2493_v49, %v1132_v53  ;;  %v1236_v59 = vsub.f32 2.0, %v1235_v54  ;;  %v1797_v49 = vld [vmem:[%s3633_s7 + $0x28] sm:$0xff]  ;;  %v1795_v53 = vld [vmem:[%s3633_s7 + $0x18] sm:$0xff]  ;;  %v1794_v54 = vld [vmem:[%s3633_s7 + $0x10] sm:$0xff] }
 0x2e6   : > { %1814 = vmatpush.msrb.mxu3 %v1797_v49  ;;  %v1994_v49 = vld [vmem:[%s3639_s13 + $0x68] sm:$0xff] }
 0x2e7   : > { %v1134_v58 = vmul.f32 %v3327_v13, %v1133_v57  ;;  %v1237_v62 = vmul.f32 %v2495_v52, %v1236_v59  ;;  %2016 = vmatpush.msra.mxu0 %v1994_v49 }
 0x2e8   : > { %1815 = vmatpush.msrb.mxu3 %v1796_v50  ;;  %v1874_v50 = vld [vmem:[%s3638_s12] sm:$0x3] }
 0x2e9   : > { %2309 = vmatmul.msk.f32.vlgmr.msra.gmra.mxu2 %vm622_vm2, %v1134_v58  ;;  %v1238_v2 = vmul.f32 %v3331_v16, %v1237_v62 }
 0x2ea   : > { %v2497_v61 = vpop.eup %2496  ;;  %1363 = vmatpush.msra.mxu2 %v1345_v60  ;;  %1816 = vmatpush.msrb.mxu3 %v1795_v53  ;;  %v1876_v53 = vperm.slane %v1874_v50, 0 }
 0x2eb   : > { %v1339_v63 = vmul.f32 %v2497_v61, %v1337_v56  ;;  %v1441_v0 = vpop.xlane.xlu2 %1440  ;;  %v1792_v56 = vld [vmem:[%s3633_s7] sm:$0xff] }
 0x2ec   : > { %2498 = vrcp.f32 %v1441_v0  ;;  %1364 = vmatpush.msra.mxu2 %v1344_v1  ;;  %1817 = vmatpush.msrb.mxu3 %v1794_v54  ;;  %v2520_v1 = vld [vmem:[%s2985_s20] sm:$0xff]  ;;  %v1992_v54 = vld [vmem:[%s3639_s13 + $0x58] sm:$0xff]  ;;  %s519_s20 = sand.u32 1, %s2583_s30  }
 0x2ed   : > { %v1340_v3 = vsub.f32 2.0, %v1339_v63  ;;  %s2208_s24 = sshll.u32 %s519_s20, 3 }
 0x2ee   : > { %1818 = vmatpush.msrb.mxu3 %v1793_v55  ;;  %v2011_v55 = vld [vmem:[%s3639_s13 + $0xf0] sm:$0xff] }
 0x2ef   : > { %v1341_v6 = vmul.f32 %v2497_v61, %v1340_v3  ;;  %v3399_v61 = vld [vmem:[%s3636_s10] sm:$0xff] }
 0x2f0   : > { %1819 = vmatpush.msrb.mxu3 %v1792_v56  ;;  %v1800_v62 = vperm.slane %v3399_v61, 1  ;;  %v1991_v56 = vld [vmem:[%s3639_s13 + $0x50] sm:$0xff] }
 0x2f1   : > { %2321 = vmatmul.msk.f32.vlgmr.msrb.gmra.mxu2 %vm622_vm2, %v1238_v2  ;;  %v1342_v10 = vmul.f32 %v3335_v21, %v1341_v6 }
 0x2f2   : > { %v2499_v5 = vpop.eup %2498  ;;  %1467 = vmatpush.msrb.mxu2 %v1449_v4  ;;  %v2608_v4 = vmov 64.0  }
 0x2f3   : > { %v1443_v7 = vmul.f32 %v2499_v5, %v1441_v0  ;;  %v1545_v9 = vpop.xlane.xlu1 %1544 }
 0x2f4   : > { %1468 = vmatpush.msrb.mxu2 %v1448_v8  ;;  %2500 = vrcp.f32 %v1545_v9 }
 0x2f5   : > { %v1444_v11 = vsub.f32 2.0, %v1443_v7 }
 0x2f7   : > { %v1445_v14 = vmul.f32 %v2499_v5, %v1444_v11 }
 0x2f9   : > { %2333 = vmatmul.msk.f32.vlgmr.msra.gmra.mxu2 %vm622_vm2, %v1342_v10  ;;  %v1446_v18 = vmul.f32 %v3339_v27, %v1445_v14 }
 0x2fa   : > { %v2501_v13 = vpop.eup %2500  ;;  %1571 = vmatpush.msra.mxu2 %v1553_v12 }
 0x2fb   : > { %v1547_v15 = vmul.f32 %v2501_v13, %v1545_v9  ;;  %v1649_v16 = vpop.xlane.xlu2 %1648 }
 0x2fc   : > { %2502 = vrcp.f32 %v1649_v16  ;;  %1572 = vmatpush.msra.mxu2 %v1552_v17  ;;  %v1873_v17 = vld [vmem:[%s3637_s11 + $0x78] sm:$0xff] }
 0x2fd   : > { %v1548_v19 = vsub.f32 2.0, %v1547_v15 }
 0x2ff   : > { %v1549_v21 = vmul.f32 %v2501_v13, %v1548_v19  ;;  %v1871_v19 = vld [vmem:[%s3637_s11 + $0x68] sm:$0xff] }
 0x301   : > { %2345 = vmatmul.msk.f32.vlgmr.msrb.gmra.mxu2 %vm622_vm2, %v1446_v18  ;;  %v1550_v24 = vmul.f32 %v3343_v30, %v1549_v21  ;;  %v1870_v18 = vld [vmem:[%s3637_s11 + $0x60] sm:$0xff] }
 0x302   : > { %v2503_v22 = vpop.eup %2502  ;;  %1675 = vmatpush.msrb.mxu2 %v1657_v20  ;;  %v1868_v20 = vld [vmem:[%s3637_s11 + $0x50] sm:$0xff]  ;;  %v1866_v21 = vld [vmem:[%s3637_s11 + $0x40] sm:$0xff] }
 0x303   : > { %v1651_v23 = vmul.f32 %v2503_v22, %v1649_v16  ;;  %v1753_v26 = vpop.xlane.xlu1 %1752  ;;  %v1872_v16 = vld [vmem:[%s3637_s11 + $0x70] sm:$0xff] }
 0x304   : > { %1676 = vmatpush.msrb.mxu2 %v1656_v25  ;;  %2504 = vrcp.f32 %v1753_v26  ;;  %1891 = vmatpush.msrb.mxu1 %v1872_v16  ;;  %v1864_v25 = vld [vmem:[%s3637_s11 + $0x30] sm:$0xff] }
 0x305   : > { %v1652_v28 = vsub.f32 2.0, %v1651_v23  ;;  %2506 = vrcp.f32 %v2608_v4  ;;  %v1867_v23 = vld [vmem:[%s3637_s11 + $0x48] sm:$0xff]  ;;  %v1988_v4 = vld [vmem:[%s3639_s13 + $0x38] sm:$0xff] }
 0x306   : > { %1892 = vmatpush.msrb.mxu1 %v1870_v18  ;;  %v2004_v18 = vld [vmem:[%s3639_s13 + $0xb8] sm:$0xff] }
 0x307   : > { %v1653_v27 = vmul.f32 %v2503_v22, %v1652_v28  ;;  %v1869_v22 = vld [vmem:[%s3637_s11 + $0x58] sm:$0xff]  ;;  %v1863_v28 = vld [vmem:[%s3637_s11 + $0x28] sm:$0xff] }
 0x308   : > { %1893 = vmatpush.msrb.mxu1 %v1868_v20  ;;  %v1984_v20 = vld [vmem:[%s3639_s13 + $0x18] sm:$0xff] }
 0x309   : > { %2357 = vmatmul.msk.f32.vlgmr.msra.gmra.mxu2 %vm622_vm2, %v1550_v24  ;;  %v1654_v33 = vmul.f32 %v3347_v35, %v1653_v27  ;;  %v1862_v24 = vld [vmem:[%s3637_s11 + $0x20] sm:$0xff] }
 0x30a   : > { %v2505_v29 = vpop.eup %2504  ;;  %1779 = vmatpush.msra.mxu2 %v1761_v37  ;;  %1894 = vmatpush.msrb.mxu1 %v1866_v21  ;;  %v1860_v37 = vld [vmem:[%s3637_s11 + $0x10] sm:$0xff]  ;;  %v1858_v27 = vld [vmem:[%s3637_s11] sm:$0xff] }
 0x30b   : > { %v1755_v31 = vmul.f32 %v2505_v29, %v1753_v26  ;;  %v2507_v5 = vpop.eup %2506  ;;  %v1865_v26 = vld [vmem:[%s3637_s11 + $0x38] sm:$0xff] }
 0x30c   : > { %1780 = vmatpush.msra.mxu2 %v1760_v32  ;;  %v1829_v6 = vmul.f32 64.0, %v2507_v5  ;;  %vm1833_vm10 = vweird.f32 %v2507_v5  ;;  %1895 = vmatpush.msrb.mxu1 %v1864_v25  ;;  %v2002_v25 = vld [vmem:[%s3639_s13 + $0xa8] sm:$0xff] }
 0x30d   : > { %v1756_v34 = vsub.f32 2.0, %v1755_v31  ;;  %v1859_v31 = vld [vmem:[%s3637_s11 + $0x8] sm:$0xff] }
 0x30e   : > { %v1830_v7 = vsub.f32 1.0, %v1829_v6  ;;  %1896 = vmatpush.msrb.mxu1 %v1862_v24  ;;  %v1982_v24 = vld [vmem:[%s3639_s13 + $0x8] sm:$0xff] }
 0x30f   : > { %v1757_v36 = vmul.f32 %v2505_v29, %v1756_v34  ;;  %v1861_v29 = vld [vmem:[%s3637_s11 + $0x18] sm:$0xff] }
 0x310   : > { %v1831_v8 = vmul.f32 %v2507_v5, %v1830_v7  ;;  %1897 = vmatpush.msrb.mxu1 %v1860_v37 }
 0x311   : > { %2369 = vmatmul.msk.f32.vlgmr.msrb.gmra.mxu2 %vm622_vm2, %v1654_v33  ;;  %v1758_v38 = vmul.f32 %v3351_v39, %v1757_v36 }
 0x312   : > { %v1832_v9 = vadd.f32 %v2507_v5, %v1831_v8  ;;  %1911 = vmatpush.msrb.mxu2 %v1873_v17  ;;  %1898 = vmatpush.msrb.mxu1 %v1858_v27  ;;  %v1985_v17 = vld [vmem:[%s3639_s13 + $0x20] sm:$0xff]  ;;  %v2000_v27 = vld [vmem:[%s3639_s13 + $0x98] sm:$0xff] }
 0x314   : > { %v3404_v10 = vsel %vm1833_vm10, %v2507_v5, %v1832_v9  ;;  %1912 = vmatpush.msrb.mxu2 %v1871_v19  ;;  %v2007_v5 = vld [vmem:[%s3639_s13 + $0xd0] sm:$0xff] }
 0x315   : > { %v1987_v9 = vld [vmem:[%s3639_s13 + $0x30] sm:$0xff] }
 0x316   : > { %1913 = vmatpush.msrb.mxu2 %v1869_v22  ;;  %v2003_v22 = vld [vmem:[%s3639_s13 + $0xb0] sm:$0xff] }
 0x318   : > { %1914 = vmatpush.msrb.mxu2 %v1867_v23  ;;  %v1983_v23 = vld [vmem:[%s3639_s13 + $0x10] sm:$0xff] }
 0x319   : > { %2381 = vmatmul.msk.f32.vlgmr.msra.gmra.mxu2 %vm622_vm2, %v1758_v38 }
 0x31a   : > { %1915 = vmatpush.msrb.mxu2 %v1865_v26 }
 0x31c   : > { %1916 = vmatpush.msrb.mxu2 %v1863_v28  ;;  %v2001_v28 = vld [vmem:[%s3639_s13 + $0xa0] sm:$0xff] }
 0x31e   : > { %1917 = vmatpush.msrb.mxu2 %v1861_v29  ;;  %v1981_v29 = vld [vmem:[%s3639_s13] sm:$0xff] }
 0x320   : > { %1918 = vmatpush.msrb.mxu2 %v1859_v31 }
 0x364   : > { %v1059_v30 = vpop.f32.mrf.mxu2 }
 0x365   : > { %1062 = vst.msk [vmem:[#allocation4] sm:$0xff] %vm672_vm1, %v1059_v30 }
 0x36c   : > { %v1158_v40 = vpop.f32.mrf.mxu2 }
 0x36d   : > { %1162 = vrot.lane.b32.xlu2 %v1158_v40, %s2601_s15  ;;  %s2386_s15 = sshll.u32 %s2591_s16, 3  ;;  %s2083_s16 = scalar_lea.sflag [#allocation6], %s519_s20 }
 0x374   : > { %v1262_v41 = vpop.f32.mrf.mxu2 }
 0x375   : > { %1266 = vrot.lane.b32.xlu1 %v1262_v41, %s2602_s22 }
 0x37c   : > { %v1366_v42 = vpop.f32.mrf.mxu2 }
 0x37d   : > { %1370 = vrot.lane.b32.xlu2 %v1366_v42, %s2603_s27 }
 0x384   : > { %v1470_v35 = vpop.f32.mrf.mxu2 }
 0x385   : > { %1474 = vrot.lane.b32.xlu2 %v1470_v35, %s2604_s26  ;;  %v1854_v35 = vperm.slane %v3399_v61, 2  ;;  %s2094_s26 = scalar_lea.hbm %s3640_s14, %s2386_s15 }
 0x386   : > { %s2098_s18 = sshll.u32 %s2094_s26, 4  ;;  %s2099_s18 = int_to_ptr.hbm [resolvable:$true] %s2098_s18 }
 0x387   : > { %s2535_s17 = sshra.s32 %s2099_s18, 4  ;;  %s2536_s17 = int_to_ptr.hbm [resolvable:$true] %s2535_s17 }
 0x388   : > { %s2537_s19 = scalar_lea.hbm %s2536_s17, 8  ;;  %p2542_p1 = scmp.lt.s32.totalorder %s2536_s17, %s3640_s14 }
 0x389   : > { %p2538_p12 = scmp.ne.s32.totalorder %s2536_s17, %s2537_s19 }
 0x38b   : > { %p2539_p13 = pnand %p2538_p12, %p2725_p4 }
 0x38c   : > { %v1574_v43 = vpop.f32.mrf.mxu2 }
 0x38d   : > { %1578 = vrot.lane.b32.xlu1 %v1574_v43, %s2605_s28  ;;  %p2540_p0 = pneg %p2539_p13 }
 0x394   : > { %v1678_v39 = vpop.f32.mrf.mxu2 }
 0x395   : > { %1682 = vrot.lane.b32.xlu2 %v1678_v39, %s2606_s29  ;;  %s521_s29 = scalar_lea.vmem [#allocation5], %s2208_s24  ;;  %s2541_s24 = scalar_lea.hbm %s3640_s14, 16 }
 0x396   : > { %p2543_p2 = scmp.lt.s32.totalorder %s2541_s24, %s2537_s19 }
 0x398   : > { %p2544_p3 = por %p2543_p2, %p2542_p1 }
 0x39a   : > { %p2545_p5 = pnand %p2544_p3, %p2540_p0 }
 0x39c   : > { %v1782_v44 = vpop.f32.mrf.mxu2 }
 0x39d   : > { %1786 = vrot.lane.b32.xlu1 %v1782_v44, %s2607_s25  ;;  %v1856_v44 = vperm.slane %v3399_v61, 3  ;;  %s2096_s25 = sshll.u32 %s521_s29, 4  ;;  %s2097_s25 = int_to_ptr.vmem [resolvable:$true] %s2096_s25 }
 0x3c7   : > { %v1163_v45 = vpop.permute.xlu2 %1162 }
 0x3c8   : > { %1166 = vst.msk [vmem:[#allocation4] sm:$0xff] %vm1165_vm3, %v1163_v45 }
 0x3d7   : > { %v1371_v46 = vpop.permute.xlu2 %1370 }
 0x3df   : > { %v1475_v52 = vpop.permute.xlu2 %1474 }
 0x3e7   : > { %v1267_v51 = vpop.permute.xlu1 %1266 }
 0x3e8   : > { %1270 = vst.msk [vmem:[#allocation4] sm:$0xff] %vm1269_vm4, %v1267_v51  ;;  %v1993_v51 = vld [vmem:[%s3639_s13 + $0x60] sm:$0xff] }
 0x3e9   : > { %1374 = vst.msk [vmem:[#allocation4] sm:$0xff] %vm1373_vm5, %v1371_v46  ;;  %2017 = vmatpush.msra.mxu0 %v1993_v51 }
 0x3ea   : > { %1478 = vst.msk [vmem:[#allocation4] sm:$0xff] %vm1477_vm6, %v1475_v52  ;;  %v2012_v52 = vld [vmem:[%s3639_s13 + $0xf8] sm:$0xff] }
 0x3eb   : > { %2034 = vmatpush.msra.mxu3 %v2012_v52  ;;  %2018 = vmatpush.msra.mxu0 %v1992_v54 }
 0x3ed   : > { %2035 = vmatpush.msra.mxu3 %v2011_v55  ;;  %2019 = vmatpush.msra.mxu0 %v1991_v56 }
 0x3ef   : > { %v1683_v58 = vpop.permute.xlu2 %1682 }
 0x3ff   : > { %v1579_v57 = vpop.permute.xlu1 %1578 }
 0x400   : > { %1582 = vst.msk [vmem:[#allocation4] sm:$0xff] %vm1581_vm7, %v1579_v57  ;;  %v2010_v57 = vld [vmem:[%s3639_s13 + $0xe8] sm:$0xff] }
 0x401   : > { %1686 = vst.msk [vmem:[#allocation4] sm:$0xff] %vm1685_vm8, %v1683_v58  ;;  %2036 = vmatpush.msra.mxu3 %v2010_v57 }
 0x40f   : > { %v1787_v59 = vpop.permute.xlu1 %1786 }
 0x410   : > { %1790 = vst.msk [vmem:[#allocation4] sm:$0xff] %vm1789_vm9, %v1787_v59 }
 0x417   : > { %v1791_v60 = vld [vmem:[#allocation4] sm:$0xff] }
 0x418   : > { %2382 = vmatmul.msk.f32.vlgmr.msrb.gmra.mxu3 %vm560_vm0, %v1791_v60  ;;  %v1990_v60 = vld [vmem:[%s3639_s13 + $0x48] sm:$0xff] }
 0x419   : > { %2020 = vmatpush.msra.mxu0 %v1990_v60 }
 0x49b   : > { %v1821_v63 = vpop.f32.mrf.mxu3 }
 0x49c   : > { %v1822_v0 = vadd.f32 %v1821_v63, %v1800_v62  ;;  %v2009_v62 = vld [vmem:[%s3639_s13 + $0xe0] sm:$0xff] }
 0x49d   : > { %2037 = vmatpush.msra.mxu3 %v2009_v62 }
 0x49e   : > { %v1824_v2 = vadd.f32 %v2520_v1, %v1822_v0  ;;  %v1877_v0 = vperm.slane %v1874_v50, 1  ;;  %v1989_v1 = vld [vmem:[%s3639_s13 + $0x40] sm:$0xff] }
 0x49f   : > { %2021 = vmatpush.msra.mxu0 %v1989_v1 }
 0x4a0   : > { %v1825_v3 = vsel %vm560_vm0, %v1824_v2, 0.0 }
 0x4a1   : > { %1826 = vadd.xlane.f32.xlu2 %v1825_v3  ;;  %2022 = vmatpush.msra.mxu0 %v1988_v4 }
 0x4a3   : > { %2023 = vmatpush.msra.mxu0 %v1987_v9 }
 0x514   : > { %v1827_v11 = vpop.xlane.xlu2 %1826 }
 0x515   : > { %v1835_v12 = vmul.f32 %v3404_v10, %v1827_v11  ;;  %v2006_v11 = vld [vmem:[%s3639_s13 + $0xc8] sm:$0xff] }
 0x517   : > { %v1836_v13 = vsub.f32 %v1824_v2, %v1835_v12  ;;  %v2008_v2 = vld [vmem:[%s3639_s13 + $0xd8] sm:$0xff] }
 0x518   : > { %2038 = vmatpush.msra.mxu3 %v2008_v2 }
 0x519   : > { %v1837_v14 = vmul.f32 %v1836_v13, %v1836_v13 }
 0x51a   : > { %2039 = vmatpush.msra.mxu3 %v2007_v5 }
 0x51b   : > { %v1838_v15 = vsel %vm560_vm0, %v1837_v14, 0.0  ;;  %v1986_v14 = vld [vmem:[%s3639_s13 + $0x28] sm:$0xff] }
 0x51c   : > { %1839 = vadd.xlane.f32.xlu1 %v1838_v15  ;;  %2040 = vmatpush.msra.mxu3 %v2006_v11  ;;  %v2005_v15 = vld [vmem:[%s3639_s13 + $0xc0] sm:$0xff] }
 0x51d   : > { %2024 = vmatpush.msra.mxu0 %v1986_v14 }
 0x51e   : > { %2041 = vmatpush.msra.mxu3 %v2005_v15 }
 0x51f   : > { %2025 = vmatpush.msra.mxu0 %v1985_v17 }
 0x520   : > { %2042 = vmatpush.msra.mxu3 %v2004_v18 }
 0x521   : > { %2026 = vmatpush.msra.mxu0 %v1984_v20 }
 0x522   : > { %2043 = vmatpush.msra.mxu3 %v2003_v22 }
 0x523   : > { %2027 = vmatpush.msra.mxu0 %v1983_v23  ;;  %v2013_v23 = vperm.slane %v3399_v61, 6 }
 0x524   : > { %2044 = vmatpush.msra.mxu3 %v2002_v25 }
 0x525   : > { %2028 = vmatpush.msra.mxu0 %v1982_v24 }
 0x526   : > { %2045 = vmatpush.msra.mxu3 %v2001_v28 }
 0x527   : > { %2029 = vmatpush.msra.mxu0 %v1981_v29 }
 0x528   : > { %2046 = vmatpush.msra.mxu3 %v2000_v27 }
 0x58f   : > { %v1840_v32 = vpop.xlane.xlu1 %1839 }
 0x590   : > { %v1841_v33 = vmul.f32 %v1840_v32, %v3404_v10  ;;  %v1999_v32 = vld [vmem:[%s3639_s13 + $0x90] sm:$0xff] }
 0x591   : > { %2047 = vmatpush.msra.mxu3 %v1999_v32 }
 0x592   : > { %v1842_v34 = vadd.f32 1e-05, %v1841_v33 }
 0x594   : > { %2508 = vrsqrt.f32 %v1842_v34  ;;  %vm1849_vm12 = vweird.f32 %v1842_v34 }
 0x59a   : > { %v2509_v36 = vpop.eup %2508 }
 0x59b   : > { %v1844_v38 = vmul.f32 %v2509_v36, %v1842_v34  ;;  %vm1850_vm11 = vweird.f32 %v2509_v36 }
 0x59c   : > { %vm1851_vm13 = vmor %vm1849_vm12, %vm1850_vm11 }
 0x59d   : > { %v1845_v30 = vmul.f32 %v2509_v36, %v1844_v38  ;;  %v1998_v38 = vld [vmem:[%s3639_s13 + $0x88] sm:$0xff] }
 0x59e   : > { %2048 = vmatpush.msra.mxu3 %v1998_v38 }
 0x59f   : > { %v1846_v40 = vmul.f32 0.5, %v1845_v30 }
 0x5a1   : > { %v1847_v41 = vsub.f32 1.5, %v1846_v40 }
 0x5a3   : > { %v1848_v42 = vmul.f32 %v2509_v36, %v1847_v41  ;;  %v1997_v41 = vld [vmem:[%s3639_s13 + $0x80] sm:$0xff] }
 0x5a4   : > { %2049 = vmatpush.msra.mxu3 %v1997_v41 }
 0x5a5   : > { %v1852_v43 = vsel %vm1851_vm13, %v2509_v36, %v1848_v42 }
 0x5a6   : > { %v1853_v39 = vmul.f32 %v1852_v43, %v1836_v13 }
 0x5a8   : > { %v1855_v45 = vmul.f32 %v1854_v35, %v1853_v39 }
 0x5aa   : > { %v3459_v46 = vadd.f32 %v1856_v44, %v1855_v45 }
 0x5ac   : > { %2383 = vmatmul.msk.f32.vlgmr.msrb.gmra.mxu1 %vm560_vm0, %v3459_v46  ;;  %2384 = vmatmul.msk.f32.vlgmr.msrb.gmra.mxu2 %vm560_vm0, %v3459_v46 }
 0x629   : > { %v1900_v58 = vpop.f32.mrf.mxu1 }
 0x62a   : > { %v3495_v59 = vadd.f32 %v1900_v58, %v1876_v53 }
 0x62c   : > { %v3504_v63 = vmul.f32 0.70710677, %v3495_v59  ;;  %v1923_v14 = vmul.f32 0.5, %v3495_v59 }
 0x62e   : > { %v1931_v3 = vand.u32 2147483647, %v3504_v63  ;;  %vm1927_vm14 = vcmp.ge.f32.partialorder %v3504_v63, 0.0 }
 0x62f   : > { %v1920_v6 = vpop.f32.mrf.mxu2 }
 0x630   : > { %v1933_v7 = vmul.f32 0.3275911, %v1931_v3  ;;  %v3519_v8 = vadd.f32 %v1920_v6, %v1877_v0  ;;  %v1963_v36 = vsub.f32 0.0, %v1931_v3  ;;  %v2609_v6 = vmov -1.0  }
 0x632   : > { %v1935_v12 = vadd.f32 1.0, %v1933_v7  ;;  %v3528_v13 = vmul.f32 0.70710677, %v3519_v8  ;;  %v1965_v43 = vmul.f32 %v1963_v36, %v1931_v3  ;;  %v1929_v7 = vsel %vm1927_vm14, 1.0, %v2609_v6 }
 0x633   : > { %v1924_v63 = vmul.f32 0.5, %v3519_v8 }
 0x634   : > { %2510 = vrcp.f32 %v1935_v12  ;;  %v1932_v16 = vand.u32 2147483647, %v3528_v13  ;;  %v1967_v49 = vmul.f32 1.442695, %v1965_v43  ;;  %vm1928_vm15 = vcmp.ge.f32.partialorder %v3528_v13, 0.0 }
 0x635   : > { %v2079_v43 = vperm.slane %v3399_v61, 5 }
 0x636   : > { %v1934_v19 = vmul.f32 0.3275911, %v1932_v16  ;;  %v1964_v45 = vsub.f32 0.0, %v1932_v16 }
 0x638   : > { %v1936_v21 = vadd.f32 1.0, %v1934_v19  ;;  %v1966_v52 = vmul.f32 %v1964_v45, %v1932_v16  ;;  %v1930_v19 = vsel %vm1928_vm15, 1.0, %v2609_v6 }
 0x63a   : > { %v2511_v26 = vpop.eup %2510  ;;  %2512 = vrcp.f32 %v1936_v21  ;;  %v1969_v57 = vmul.f32 1.442695, %v1966_v52 }
 0x63b   : > { %v1939_v37 = vmul.f32 %v2511_v26, %v1935_v12  ;;  %2514 = vpow2.f32 %v1967_v49 }
 0x63c   : > { %2516 = vpow2.f32 %v1969_v57 }
 0x63d   : > { %v1941_v31 = vsub.f32 2.0, %v1939_v37 }
 0x63f   : > { %v1943_v33 = vmul.f32 %v2511_v26, %v1941_v31 }
 0x640   : > { %v2513_v34 = vpop.eup %2512 }
 0x641   : > { %v1945_v30 = vmul.f32 1.0614054, %v1943_v33  ;;  %v1940_v40 = vmul.f32 %v2513_v34, %v1936_v21  ;;  %v2515_v1 = vpop.eup %2514 }
 0x642   : > { %v2517_v12 = vpop.eup %2516 }
 0x643   : > { %v1947_v42 = vadd.f32 -1.4531521, %v1945_v30  ;;  %v1942_v35 = vsub.f32 2.0, %v1940_v40 }
 0x645   : > { %v1949_v39 = vmul.f32 %v1947_v42, %v1943_v33  ;;  %v1944_v44 = vmul.f32 %v2513_v34, %v1942_v35  ;;  %v2077_v42 = vperm.slane %v3399_v61, 4 }
 0x647   : > { %v1951_v47 = vadd.f32 1.4214138, %v1949_v39  ;;  %v1946_v48 = vmul.f32 1.0614054, %v1944_v44 }
 0x649   : > { %v1953_v50 = vmul.f32 %v1951_v47, %v1943_v33  ;;  %v1948_v51 = vadd.f32 -1.4531521, %v1946_v48 }
 0x64b   : > { %v1955_v53 = vadd.f32 -0.28449672, %v1953_v50  ;;  %v1950_v54 = vmul.f32 %v1948_v51, %v1944_v44 }
 0x64d   : > { %v1957_v55 = vmul.f32 %v1955_v53, %v1943_v33  ;;  %v1952_v56 = vadd.f32 1.4214138, %v1950_v54 }
 0x64f   : > { %v1959_v58 = vadd.f32 0.2548296, %v1957_v55  ;;  %v1954_v60 = vmul.f32 %v1952_v56, %v1944_v44 }
 0x651   : > { %v1961_v62 = vmul.f32 %v1959_v58, %v1943_v33  ;;  %v1956_v0 = vadd.f32 -0.28449672, %v1954_v60 }
 0x653   : > { %v1971_v2 = vmul.f32 %v2515_v1, %v1961_v62  ;;  %v1958_v3 = vmul.f32 %v1956_v0, %v1944_v44 }
 0x655   : > { %v1973_v4 = vsub.f32 1.0, %v1971_v2  ;;  %v1960_v5 = vadd.f32 0.2548296, %v1958_v3 }
 0x657   : > { %v1975_v9 = vmul.f32 %v1973_v4, %v1929_v7  ;;  %v1962_v11 = vmul.f32 %v1960_v5, %v1944_v44 }
 0x659   : > { %v1977_v15 = vadd.f32 1.0, %v1975_v9  ;;  %v1972_v16 = vmul.f32 %v2517_v12, %v1962_v11 }
 0x65b   : > { %v1979_v17 = vmul.f32 %v1977_v15, %v1923_v14  ;;  %v1974_v18 = vsub.f32 1.0, %v1972_v16 }
 0x65d   : > { %v1976_v20 = vmul.f32 %v1974_v18, %v1930_v19  ;;  %2030 = vmatmul.f32.vlgmr.msra.gmra.mxu0 %v1979_v17 }
 0x65f   : > { %v1978_v22 = vadd.f32 1.0, %v1976_v20 }
 0x661   : > { %v1980_v21 = vmul.f32 %v1978_v22, %v1924_v63 }
 0x663   : > { %2050 = vmatmul.f32.vlgmr.msra.gmra.mxu3 %v1980_v21 }
 0x6da   : > { %v2031_v25 = vpop.f32.mrf.mxu0 }
 0x6db   : > { %v2032_v26 = vadd.f32 %v2031_v25, %v2013_v23 }
 0x6e6   : > { %v2051_v24 = vpop.f32.mrf.mxu3 }
 0x6e7   : > { %v2052_v59 = vadd.f32 %v2051_v24, %v2032_v26 }
 0x6e9   : > { %v2054_v28 = vadd.f32 %v2052_v59, %v3459_v46 }
 0x6eb   : > { %v2055_v13 = vsel %vm560_vm0, %v2054_v28, 0.0 }
 0x6ec   : > { %2056 = vadd.xlane.f32.xlu2 %v2055_v13 }
 0x75f   : > { %v2057_v37 = vpop.xlane.xlu2 %2056 }
 0x760   : > { %v2058_v29 = vmul.f32 %v2057_v37, %v3404_v10 }
 0x762   : > { %v2059_v27 = vsub.f32 %v2054_v28, %v2058_v29 }
 0x764   : > { %v2060_v8 = vmul.f32 %v2059_v27, %v2059_v27 }
 0x766   : > { %v2061_v31 = vsel %vm560_vm0, %v2060_v8, 0.0 }
 0x767   : > { %2062 = vadd.xlane.f32.xlu1 %v2061_v31 }
 0x7da   : > { %v2063_v32 = vpop.xlane.xlu1 %2062 }
 0x7db   : > { %v2064_v33 = vmul.f32 %v2063_v32, %v3404_v10 }
 0x7dd   : > { %v2065_v34 = vadd.f32 1e-05, %v2064_v33 }
 0x7df   : > { %2518 = vrsqrt.f32 %v2065_v34  ;;  %vm2072_vm2 = vweird.f32 %v2065_v34 }
 0x7e5   : > { %v2519_v36 = vpop.eup %2518 }
 0x7e6   : > { %v2067_v46 = vmul.f32 %v2519_v36, %v2065_v34  ;;  %vm2073_vm1 = vweird.f32 %v2519_v36 }
 0x7e7   : > { %vm2074_vm3 = vmor %vm2072_vm2, %vm2073_vm1 }
 0x7e8   : > { %v2068_v38 = vmul.f32 %v2519_v36, %v2067_v46 }
 0x7ea   : > { %v2069_v30 = vmul.f32 0.5, %v2068_v38 }
 0x7ec   : > { %v2070_v40 = vsub.f32 1.5, %v2069_v30 }
 0x7ee   : > { %v2071_v41 = vmul.f32 %v2519_v36, %v2070_v40 }
 0x7f0   : > { %v2075_v10 = vsel %vm2074_vm3, %v2519_v36, %v2071_v41 }
 0x7f1   : > { %v2076_v35 = vmul.f32 %v2075_v10, %v2059_v27 }
 0x7f3   : > { %v2078_v39 = vmul.f32 %v2077_v42, %v2076_v35 }
 0x7f5   : > { %v2080_v44 = vadd.f32 %v2079_v43, %v2078_v39 }
 0x7f7   : > { %2081 = vst.msk [vmem:[%s521_s29] sm:$0xff] %vm560_vm0, %v2080_v44 }
 0x7f8   : > { %2548 = shalt.err (!%p2545_p5)
}
 0x7f9   : > { %2391 = dma.vmem_to_hbm [thread:$0]  (%p2725_p4), %s2097_s25, 128, %s2099_s18, %s2083_s16  }
 0x7fa PF: > { %s3661_s20 = sld [smem:[#allocation11_spill]] }
 0x7fb   : > { %s3662_s27 = sld [smem:[#allocation8_spill]] }
 0x800   : > { %p2397_p6 = scmp.ge.s32.totalorder %s3661_s20, 2 }
 0x801   : > { %s2110_s29 = sand.u32 1, %s3662_s27  }
 0x802   : > { %p2394_p7 = pnand %p2397_p6, %p2732_p8  ;;  %s2111_s23 = scalar_lea.sflag [#allocation6], %s2110_s29 }
 0x804   : > { %p2395_p9 = pneg %p2394_p7 }
 0x806   : > { %2574 = dma.done.wait (%p2395_p9), %s2111_s23, 128  }
 0x807   : > { %2576 = vsyncadd (%p2395_p9), %s2111_s23, 4294967168  ;;  %s27_s18 = sadd.s32 1, %s3661_s20   ;;  %s3664_s17 = sld [smem:[#allocation9_spill]] }
 0x808   : > { %p24_p10 = scmp.ge.s32.totalorder %s27_s18, 4   ;;  %s3665_s15 = sld [smem:[#allocation15_spill]] }
 0x809   : > { %s3666_s16 = sld [smem:[#allocation10_spill]]  ;;  %s3668_s29 = smov %s2583_s30 }
 0x80a   : > { %s3667_s28 = sld [smem:[#allocation12_spill]] }
 0x80c   :  { %26 = sbr.rel (!%p24_p10) target bundleno = 4 (0x4), region = 166 }
 0x80d   : > { %s3669_s30 = smov %s3664_s17 }
 0x810   : > { %s3670_s17 = smov %s3667_s28 }
 0x811   :  { %2117 = vsyncpa [#allocation6], 1 }
 0x812   :  { %2119 = vsyncpa [#allocation6 + $0x1], 1 }

</bundles_post_ra>
